<compile_context>
chip_gen: v6e
topology: v6e:2x2x1
jax: 0.10.0
libtpu: 0.0.40
codegen_flags: <defaults>
</compile_context>

<pallas_src>
import jax
import jax.numpy as jnp
from jax import lax
from jax.experimental import pallas as pl
from jax.experimental.pallas import tpu as pltpu


def _make_bottleneck_kernel(H, W):
    HW = H * W
    # Tap order t = ky*3 + kx; flat spatial offset d = (ky-1)*W + (kx-1).
    tap_offsets = [(ky - 1) * W + (kx - 1) for ky in range(3) for kx in range(3)]

    def kernel(x_ref, wA_ref, bA_ref, wB_ref, bB_ref, mask_ref,
               w1t_ref, b1_ref, w2_ref, b2_ref, wC_ref, bC_ref, out_ref):
        # (Cin, HW): channels on sublanes, all HW spatial positions on lanes.
        x = x_ref[0].astype(jnp.float32)

        # --- convA: 1x1 conv (+ folded BN) + ReLU (weights as left operand) --
        a = jnp.dot(wA_ref[...], x, preferred_element_type=jnp.float32)
        a = jnp.maximum(a + bA_ref[...], 0.0)                     # (Cb, HW)

        # --- convB: 3x3 grouped conv = 9 lane-rolls + block-diag matmuls -----
        # out[:, p] = sum_t W_t @ a[:, p + d_t]; out-of-image taps are zeroed
        # by precomputed per-tap halo masks (1, HW) broadcast over channels.
        acc = jnp.dot(wB_ref[4], a, preferred_element_type=jnp.float32)  # centre
        for t, d in enumerate(tap_offsets):
            if d == 0:
                continue
            shifted = pltpu.roll(a, (-d) % HW, axis=1)    # shifted[:,p] = a[:,p+d]
            shifted = shifted * mask_ref[pl.ds(t, 1), :]  # zero halo positions
            acc = acc + jnp.dot(wB_ref[t], shifted,
                                preferred_element_type=jnp.float32)
        b = jnp.maximum(acc + bB_ref[...], 0.0)                   # (Cb, HW)

        # --- SE block (after conv2, per RegNet) on VPU/XLU -------------------
        s = jnp.mean(b, axis=1, keepdims=True)                            # (Cb, 1)
        h1 = jnp.sum(w1t_ref[...] * s, axis=0, keepdims=True) + b1_ref[...]  # (1, Cse)
        h1 = jnp.maximum(h1, 0.0)
        g = jnp.sum(w2_ref[...] * h1, axis=1, keepdims=True) + b2_ref[...]   # (Cb, 1)
        b = b * jax.nn.sigmoid(g)

        # --- convC: 1x1 conv (+BN, no act) + identity shortcut + ReLU --------
        c = jnp.dot(wC_ref[...], b, preferred_element_type=jnp.float32) + bC_ref[...]
        out_ref[0] = jnp.maximum(c + x, 0.0).astype(out_ref.dtype)  # lane-dense store

    return kernel


def _make_halo_masks(H, W):
    ys = jnp.arange(H).reshape(H, 1)
    xs = jnp.arange(W).reshape(1, W)
    masks = []
    for ky in range(3):
        for kx in range(3):
            dy, dx = ky - 1, kx - 1
            valid = ((ys + dy >= 0) & (ys + dy < H) &
                     (xs + dx >= 0) & (xs + dx < W))
            masks.append(valid.reshape(-1).astype(jnp.float32))
    return jnp.stack(masks)                                   # (9, H*W)


def bottleneck_forward(x_nchw, p):
    # TODO(synk): stride>1 / dilation>1 / projection-downsample branch not
    # implemented (module instantiated with downsample=None, stride=1 here).
    N, Cin, H, W = x_nchw.shape
    HW = H * W
    x = x_nchw.reshape(N, Cin, HW)        # NCHW -> (N, C, H*W): pure reshape
    Cb = p['wA'].shape[0]
    Cout = p['wC'].shape[0]
    Cse = p['w1t'].shape[1]
    masks = _make_halo_masks(H, W)

    kernel = _make_bottleneck_kernel(H, W)
    out = pl.pallas_call(
        kernel,
        out_shape=jax.ShapeDtypeStruct((N, Cout, HW), x.dtype),
        grid_spec=pltpu.PrefetchScalarGridSpec(
            num_scalar_prefetch=0,
            grid=(N,),
            in_specs=[
                pl.BlockSpec((1, Cin, HW), lambda n: (n, 0, 0)),
                pl.BlockSpec((Cb, Cin), lambda n: (0, 0)),
                pl.BlockSpec((Cb, 1), lambda n: (0, 0)),
                pl.BlockSpec((9, Cb, Cb), lambda n: (0, 0, 0)),
                pl.BlockSpec((Cb, 1), lambda n: (0, 0)),
                pl.BlockSpec((9, HW), lambda n: (0, 0)),
                pl.BlockSpec((Cb, Cse), lambda n: (0, 0)),
                pl.BlockSpec((1, Cse), lambda n: (0, 0)),
                pl.BlockSpec((Cb, Cse), lambda n: (0, 0)),
                pl.BlockSpec((Cb, 1), lambda n: (0, 0)),
                pl.BlockSpec((Cout, Cb), lambda n: (0, 0)),
                pl.BlockSpec((Cout, 1), lambda n: (0, 0)),
            ],
            out_specs=pl.BlockSpec((1, Cout, HW), lambda n: (n, 0, 0)),
        ),
        compiler_params=pltpu.CompilerParams(
            dimension_semantics=("parallel",)),   # one image per TensorCore on v7x
    )(x, p['wA'], p['bA'], p['wB_blk'], p['bB'], masks,
      p['w1t'], p['b1'], p['w2'], p['b2'], p['wC'], p['bC'])
    return out.reshape(N, Cout, H, W)


def make_params(key, in_chs, out_chs, bottleneck_ratio=1.0, group_width=16,
                se_ratio=0.25):
    Cb = int(round(out_chs * bottleneck_ratio))
    groups = Cb // group_width
    Cg = Cb // groups
    Cse = int(round(in_chs * se_ratio))
    ks = jax.random.split(key, 8)

    def conv_bn(k, co, ci, kh, kw):
        k1, k2, k3, k4, k5 = jax.random.split(k, 5)
        w = jax.random.normal(k1, (co, ci, kh, kw), jnp.float32) * 0.1   # OIHW
        gamma = 1.0 + 0.1 * jax.random.normal(k2, (co,), jnp.float32)
        beta = 0.1 * jax.random.normal(k3, (co,), jnp.float32)
        mean = 0.1 * jax.random.normal(k4, (co,), jnp.float32)
        var = jnp.abs(jax.random.normal(k5, (co,), jnp.float32)) + 0.5
        scale = gamma / jnp.sqrt(var + 1e-5)                 # eval-mode BN fold
        return w * scale[:, None, None, None], beta - mean * scale

    wA, bA = conv_bn(ks[0], Cb, in_chs, 1, 1)
    wB, bB = conv_bn(ks[1], Cb, Cg, 3, 3)                    # grouped conv weight
    wC, bC = conv_bn(ks[2], out_chs, Cb, 1, 1)
    w1 = jax.random.normal(ks[3], (Cse, Cb, 1, 1), jnp.float32) * 0.1
    b1 = 0.1 * jax.random.normal(ks[4], (Cse,), jnp.float32)
    w2 = jax.random.normal(ks[5], (Cb, Cse, 1, 1), jnp.float32) * 0.1
    b2 = 0.1 * jax.random.normal(ks[6], (Cb,), jnp.float32)

    # Block-diagonal per-tap convB weight (tap, c_out, c_in) for the left matmul.
    wB_blk = jnp.zeros((9, Cb, Cb), jnp.float32)
    for g in range(groups):
        blk = jnp.transpose(wB[g * Cg:(g + 1) * Cg], (2, 3, 0, 1)).reshape(9, Cg, Cg)
        wB_blk = wB_blk.at[:, g * Cg:(g + 1) * Cg, g * Cg:(g + 1) * Cg].set(blk)

    p = dict(
        wA=wA[:, :, 0, 0],                                   # (Cb, Cin)
        bA=bA.reshape(Cb, 1),
        wB_blk=wB_blk,                                       # (9, Cb, Cb)
        bB=bB.reshape(Cb, 1),
        w1t=jnp.transpose(w1[:, :, 0, 0], (1, 0)),           # (Cb, Cse)
        b1=b1.reshape(1, Cse),
        w2=w2[:, :, 0, 0],                                   # (Cb, Cse)
        b2=b2.reshape(Cb, 1),
        wC=wC[:, :, 0, 0],                                   # (Cout, Cb)
        bC=bC.reshape(out_chs, 1),
        # copies for the pure-JAX reference check
        wA_hwio=jnp.transpose(wA, (2, 3, 1, 0)),
        wB_hwio=jnp.transpose(wB, (2, 3, 1, 0)),
        wC_hwio=jnp.transpose(wC, (2, 3, 1, 0)),
        w1_se=w1[:, :, 0, 0],                                # (Cse, Cb)
        groups=groups,
    )
    return p


def ref_forward(x_nchw, p):
    x = jnp.transpose(x_nchw, (0, 2, 3, 1))
    dn = ('NHWC', 'HWIO', 'NHWC')
    a = jax.nn.relu(lax.conv_general_dilated(x, p['wA_hwio'], (1, 1), 'VALID',
                                             dimension_numbers=dn)
                    + p['bA'].reshape(-1))
    b = jax.nn.relu(lax.conv_general_dilated(a, p['wB_hwio'], (1, 1),
                                             ((1, 1), (1, 1)),
                                             dimension_numbers=dn,
                                             feature_group_count=p['groups'])
                    + p['bB'].reshape(-1))
    s = jnp.mean(b, axis=(1, 2), keepdims=True)
    h1 = jax.nn.relu(jnp.einsum('nhwc,jc->nhwj', s, p['w1_se'])
                     + p['b1'].reshape(-1))
    gate = jax.nn.sigmoid(jnp.einsum('nhwj,cj->nhwc', h1, p['w2'])
                          + p['b2'].reshape(-1))
    b = b * gate
    c = lax.conv_general_dilated(b, p['wC_hwio'], (1, 1), 'VALID',
                                 dimension_numbers=dn) + p['bC'].reshape(-1)
    out = jax.nn.relu(c + x)
    return jnp.transpose(out, (0, 3, 1, 2))


if __name__ == "__main__":
    key = jax.random.PRNGKey(0)
    kx, kp = jax.random.split(key)
    # Small RegNet-style config: in_chs == out_chs (identity shortcut, no
    # downsample), bottleneck_ratio=1, group_width=16 -> groups=2, se_ratio=0.25.
    N, Cin, H, W = 2, 32, 16, 16
    x = jax.random.normal(kx, (N, Cin, H, W), jnp.float32)
    params = make_params(kp, in_chs=Cin, out_chs=Cin, bottleneck_ratio=1.0,
                         group_width=16, se_ratio=0.25)

    out = bottleneck_forward(x, params)
    out = jax.block_until_ready(out)

    ref = ref_forward(x, params)
    assert out.shape == (N, Cin, H, W)
    assert jnp.allclose(out, ref, rtol=1e-3, atol=1e-3), \
        float(jnp.max(jnp.abs(out - ref)))
    print("KERNEL_OK")
</pallas_src>

<mosaic_0001>
module attributes {stable_mosaic.version = 11 : i64} {
  func.func @kernel(%arg0: i32, %arg1: memref<1x32x256xf32, #tpu.memory_space<vmem>>, %arg2: memref<32x32xf32, #tpu.memory_space<vmem>>, %arg3: memref<32x1xf32, #tpu.memory_space<vmem>>, %arg4: memref<9x32x32xf32, #tpu.memory_space<vmem>>, %arg5: memref<32x1xf32, #tpu.memory_space<vmem>>, %arg6: memref<9x256xf32, #tpu.memory_space<vmem>>, %arg7: memref<32x8xf32, #tpu.memory_space<vmem>>, %arg8: memref<1x8xf32, #tpu.memory_space<vmem>>, %arg9: memref<32x8xf32, #tpu.memory_space<vmem>>, %arg10: memref<32x1xf32, #tpu.memory_space<vmem>>, %arg11: memref<32x32xf32, #tpu.memory_space<vmem>>, %arg12: memref<32x1xf32, #tpu.memory_space<vmem>>, %arg13: memref<1x32x256xf32, #tpu.memory_space<vmem>>) attributes {dimension_semantics = [#tpu.dimension_semantics<parallel>], iteration_bounds = array<i64: 2>, scalar_prefetch = 0 : i64, scratch_operands = 0 : i64, tpu.core_type = #tpu.core_type<tc>, window_params = [{transform_indices = @transform_0, window_bounds = array<i64: 1, 32, 256>}, {pipeline_mode = #tpu.pipeline_mode<synchronous>, transform_indices = @transform_1, window_bounds = array<i64: 32, 32>}, {pipeline_mode = #tpu.pipeline_mode<synchronous>, transform_indices = @transform_2, window_bounds = array<i64: 32, 1>}, {pipeline_mode = #tpu.pipeline_mode<synchronous>, transform_indices = @transform_3, window_bounds = array<i64: 9, 32, 32>}, {pipeline_mode = #tpu.pipeline_mode<synchronous>, transform_indices = @transform_4, window_bounds = array<i64: 32, 1>}, {pipeline_mode = #tpu.pipeline_mode<synchronous>, transform_indices = @transform_5, window_bounds = array<i64: 9, 256>}, {pipeline_mode = #tpu.pipeline_mode<synchronous>, transform_indices = @transform_6, window_bounds = array<i64: 32, 8>}, {pipeline_mode = #tpu.pipeline_mode<synchronous>, transform_indices = @transform_7, window_bounds = array<i64: 1, 8>}, {pipeline_mode = #tpu.pipeline_mode<synchronous>, transform_indices = @transform_8, window_bounds = array<i64: 32, 8>}, {pipeline_mode = #tpu.pipeline_mode<synchronous>, transform_indices = @transform_9, window_bounds = array<i64: 32, 1>}, {pipeline_mode = #tpu.pipeline_mode<synchronous>, transform_indices = @transform_10, window_bounds = array<i64: 32, 32>}, {pipeline_mode = #tpu.pipeline_mode<synchronous>, transform_indices = @transform_11, window_bounds = array<i64: 32, 1>}, {transform_indices = @transform_12, window_bounds = array<i64: 1, 32, 256>}]} {
    %c0 = arith.constant 0 : index
    %c0_0 = arith.constant 0 : index
    %c0_1 = arith.constant 0 : index
    %0 = vector.load %arg1[%c0, %c0_0, %c0_1] : memref<1x32x256xf32, #tpu.memory_space<vmem>>, vector<1x32x256xf32>
    %1 = vector.shape_cast %0 : vector<1x32x256xf32> to vector<32x256xf32>
    %c0_2 = arith.constant 0 : index
    %c0_3 = arith.constant 0 : index
    %2 = vector.load %arg2[%c0_2, %c0_3] : memref<32x32xf32, #tpu.memory_space<vmem>>, vector<32x32xf32>
    %cst = arith.constant dense<0.000000e+00> : vector<32x256xf32>
    %3 = tpu.matmul %2, %1, %cst {dimension_numbers = #tpu.dot_dimension_numbers<[1], [0], [0], [1], [0, 0, 1, 1], [], []>} : vector<32x32xf32>, vector<32x256xf32>, vector<32x256xf32> -> vector<32x256xf32>
    %c0_4 = arith.constant 0 : index
    %c0_5 = arith.constant 0 : index
    %4 = vector.load %arg3[%c0_4, %c0_5] : memref<32x1xf32, #tpu.memory_space<vmem>>, vector<32x1xf32>
    %5 = vector.broadcast %4 : vector<32x1xf32> to vector<32x256xf32>
    %6 = arith.addf %3, %5 : vector<32x256xf32>
    %cst_6 = arith.constant 0.000000e+00 : f32
    %7 = vector.broadcast %cst_6 : f32 to vector<32x256xf32>
    %8 = arith.maximumf %6, %7 : vector<32x256xf32>
    %c4 = arith.constant 4 : index
    %c0_7 = arith.constant 0 : index
    %c0_8 = arith.constant 0 : index
    %9 = vector.load %arg4[%c4, %c0_7, %c0_8] : memref<9x32x32xf32, #tpu.memory_space<vmem>>, vector<1x32x32xf32>
    %10 = vector.shape_cast %9 : vector<1x32x32xf32> to vector<32x32xf32>
    %cst_9 = arith.constant dense<0.000000e+00> : vector<32x256xf32>
    %11 = tpu.matmul %10, %8, %cst_9 {dimension_numbers = #tpu.dot_dimension_numbers<[1], [0], [0], [1], [0, 0, 1, 1], [], []>} : vector<32x32xf32>, vector<32x256xf32>, vector<32x256xf32> -> vector<32x256xf32>
    %c17_i32 = arith.constant 17 : i32
    %12 = tpu.dynamic_rotate %8 by %c17_i32 dim 1 : vector<32x256xf32>, i32 -> vector<32x256xf32>
    %c0_10 = arith.constant 0 : index
    %c0_11 = arith.constant 0 : index
    %13 = vector.load %arg6[%c0_10, %c0_11] : memref<9x256xf32, #tpu.memory_space<vmem>>, vector<1x256xf32>
    %14 = vector.broadcast %13 : vector<1x256xf32> to vector<32x256xf32>
    %15 = arith.mulf %12, %14 : vector<32x256xf32>
    %c0_12 = arith.constant 0 : index
    %c0_13 = arith.constant 0 : index
    %c0_14 = arith.constant 0 : index
    %16 = vector.load %arg4[%c0_12, %c0_13, %c0_14] : memref<9x32x32xf32, #tpu.memory_space<vmem>>, vector<1x32x32xf32>
    %17 = vector.shape_cast %16 : vector<1x32x32xf32> to vector<32x32xf32>
    %cst_15 = arith.constant dense<0.000000e+00> : vector<32x256xf32>
    %18 = tpu.matmul %17, %15, %cst_15 {dimension_numbers = #tpu.dot_dimension_numbers<[1], [0], [0], [1], [0, 0, 1, 1], [], []>} : vector<32x32xf32>, vector<32x256xf32>, vector<32x256xf32> -> vector<32x256xf32>
    %19 = arith.addf %11, %18 : vector<32x256xf32>
    %c16_i32 = arith.constant 16 : i32
    %20 = tpu.dynamic_rotate %8 by %c16_i32 dim 1 : vector<32x256xf32>, i32 -> vector<32x256xf32>
    %c1 = arith.constant 1 : index
    %c0_16 = arith.constant 0 : index
    %21 = vector.load %arg6[%c1, %c0_16] : memref<9x256xf32, #tpu.memory_space<vmem>>, vector<1x256xf32>
    %22 = vector.broadcast %21 : vector<1x256xf32> to vector<32x256xf32>
    %23 = arith.mulf %20, %22 : vector<32x256xf32>
    %c1_17 = arith.constant 1 : index
    %c0_18 = arith.constant 0 : index
    %c0_19 = arith.constant 0 : index
    %24 = vector.load %arg4[%c1_17, %c0_18, %c0_19] : memref<9x32x32xf32, #tpu.memory_space<vmem>>, vector<1x32x32xf32>
    %25 = vector.shape_cast %24 : vector<1x32x32xf32> to vector<32x32xf32>
    %cst_20 = arith.constant dense<0.000000e+00> : vector<32x256xf32>
    %26 = tpu.matmul %25, %23, %cst_20 {dimension_numbers = #tpu.dot_dimension_numbers<[1], [0], [0], [1], [0, 0, 1, 1], [], []>} : vector<32x32xf32>, vector<32x256xf32>, vector<32x256xf32> -> vector<32x256xf32>
    %27 = arith.addf %19, %26 : vector<32x256xf32>
    %c15_i32 = arith.constant 15 : i32
    %28 = tpu.dynamic_rotate %8 by %c15_i32 dim 1 : vector<32x256xf32>, i32 -> vector<32x256xf32>
    %c2 = arith.constant 2 : index
    %c0_21 = arith.constant 0 : index
    %29 = vector.load %arg6[%c2, %c0_21] : memref<9x256xf32, #tpu.memory_space<vmem>>, vector<1x256xf32>
    %30 = vector.broadcast %29 : vector<1x256xf32> to vector<32x256xf32>
    %31 = arith.mulf %28, %30 : vector<32x256xf32>
    %c2_22 = arith.constant 2 : index
    %c0_23 = arith.constant 0 : index
    %c0_24 = arith.constant 0 : index
    %32 = vector.load %arg4[%c2_22, %c0_23, %c0_24] : memref<9x32x32xf32, #tpu.memory_space<vmem>>, vector<1x32x32xf32>
    %33 = vector.shape_cast %32 : vector<1x32x32xf32> to vector<32x32xf32>
    %cst_25 = arith.constant dense<0.000000e+00> : vector<32x256xf32>
    %34 = tpu.matmul %33, %31, %cst_25 {dimension_numbers = #tpu.dot_dimension_numbers<[1], [0], [0], [1], [0, 0, 1, 1], [], []>} : vector<32x32xf32>, vector<32x256xf32>, vector<32x256xf32> -> vector<32x256xf32>
    %35 = arith.addf %27, %34 : vector<32x256xf32>
    %c1_i32 = arith.constant 1 : i32
    %36 = tpu.dynamic_rotate %8 by %c1_i32 dim 1 : vector<32x256xf32>, i32 -> vector<32x256xf32>
    %c3 = arith.constant 3 : index
    %c0_26 = arith.constant 0 : index
    %37 = vector.load %arg6[%c3, %c0_26] : memref<9x256xf32, #tpu.memory_space<vmem>>, vector<1x256xf32>
    %38 = vector.broadcast %37 : vector<1x256xf32> to vector<32x256xf32>
    %39 = arith.mulf %36, %38 : vector<32x256xf32>
    %c3_27 = arith.constant 3 : index
    %c0_28 = arith.constant 0 : index
    %c0_29 = arith.constant 0 : index
    %40 = vector.load %arg4[%c3_27, %c0_28, %c0_29] : memref<9x32x32xf32, #tpu.memory_space<vmem>>, vector<1x32x32xf32>
    %41 = vector.shape_cast %40 : vector<1x32x32xf32> to vector<32x32xf32>
    %cst_30 = arith.constant dense<0.000000e+00> : vector<32x256xf32>
    %42 = tpu.matmul %41, %39, %cst_30 {dimension_numbers = #tpu.dot_dimension_numbers<[1], [0], [0], [1], [0, 0, 1, 1], [], []>} : vector<32x32xf32>, vector<32x256xf32>, vector<32x256xf32> -> vector<32x256xf32>
    %43 = arith.addf %35, %42 : vector<32x256xf32>
    %c255_i32 = arith.constant 255 : i32
    %44 = tpu.dynamic_rotate %8 by %c255_i32 dim 1 : vector<32x256xf32>, i32 -> vector<32x256xf32>
    %c5 = arith.constant 5 : index
    %c0_31 = arith.constant 0 : index
    %45 = vector.load %arg6[%c5, %c0_31] : memref<9x256xf32, #tpu.memory_space<vmem>>, vector<1x256xf32>
    %46 = vector.broadcast %45 : vector<1x256xf32> to vector<32x256xf32>
    %47 = arith.mulf %44, %46 : vector<32x256xf32>
    %c5_32 = arith.constant 5 : index
    %c0_33 = arith.constant 0 : index
    %c0_34 = arith.constant 0 : index
    %48 = vector.load %arg4[%c5_32, %c0_33, %c0_34] : memref<9x32x32xf32, #tpu.memory_space<vmem>>, vector<1x32x32xf32>
    %49 = vector.shape_cast %48 : vector<1x32x32xf32> to vector<32x32xf32>
    %cst_35 = arith.constant dense<0.000000e+00> : vector<32x256xf32>
    %50 = tpu.matmul %49, %47, %cst_35 {dimension_numbers = #tpu.dot_dimension_numbers<[1], [0], [0], [1], [0, 0, 1, 1], [], []>} : vector<32x32xf32>, vector<32x256xf32>, vector<32x256xf32> -> vector<32x256xf32>
    %51 = arith.addf %43, %50 : vector<32x256xf32>
    %c241_i32 = arith.constant 241 : i32
    %52 = tpu.dynamic_rotate %8 by %c241_i32 dim 1 : vector<32x256xf32>, i32 -> vector<32x256xf32>
    %c6 = arith.constant 6 : index
    %c0_36 = arith.constant 0 : index
    %53 = vector.load %arg6[%c6, %c0_36] : memref<9x256xf32, #tpu.memory_space<vmem>>, vector<1x256xf32>
    %54 = vector.broadcast %53 : vector<1x256xf32> to vector<32x256xf32>
    %55 = arith.mulf %52, %54 : vector<32x256xf32>
    %c6_37 = arith.constant 6 : index
    %c0_38 = arith.constant 0 : index
    %c0_39 = arith.constant 0 : index
    %56 = vector.load %arg4[%c6_37, %c0_38, %c0_39] : memref<9x32x32xf32, #tpu.memory_space<vmem>>, vector<1x32x32xf32>
    %57 = vector.shape_cast %56 : vector<1x32x32xf32> to vector<32x32xf32>
    %cst_40 = arith.constant dense<0.000000e+00> : vector<32x256xf32>
    %58 = tpu.matmul %57, %55, %cst_40 {dimension_numbers = #tpu.dot_dimension_numbers<[1], [0], [0], [1], [0, 0, 1, 1], [], []>} : vector<32x32xf32>, vector<32x256xf32>, vector<32x256xf32> -> vector<32x256xf32>
    %59 = arith.addf %51, %58 : vector<32x256xf32>
    %c240_i32 = arith.constant 240 : i32
    %60 = tpu.dynamic_rotate %8 by %c240_i32 dim 1 : vector<32x256xf32>, i32 -> vector<32x256xf32>
    %c7 = arith.constant 7 : index
    %c0_41 = arith.constant 0 : index
    %61 = vector.load %arg6[%c7, %c0_41] : memref<9x256xf32, #tpu.memory_space<vmem>>, vector<1x256xf32>
    %62 = vector.broadcast %61 : vector<1x256xf32> to vector<32x256xf32>
    %63 = arith.mulf %60, %62 : vector<32x256xf32>
    %c7_42 = arith.constant 7 : index
    %c0_43 = arith.constant 0 : index
    %c0_44 = arith.constant 0 : index
    %64 = vector.load %arg4[%c7_42, %c0_43, %c0_44] : memref<9x32x32xf32, #tpu.memory_space<vmem>>, vector<1x32x32xf32>
    %65 = vector.shape_cast %64 : vector<1x32x32xf32> to vector<32x32xf32>
    %cst_45 = arith.constant dense<0.000000e+00> : vector<32x256xf32>
    %66 = tpu.matmul %65, %63, %cst_45 {dimension_numbers = #tpu.dot_dimension_numbers<[1], [0], [0], [1], [0, 0, 1, 1], [], []>} : vector<32x32xf32>, vector<32x256xf32>, vector<32x256xf32> -> vector<32x256xf32>
    %67 = arith.addf %59, %66 : vector<32x256xf32>
    %c239_i32 = arith.constant 239 : i32
    %68 = tpu.dynamic_rotate %8 by %c239_i32 dim 1 : vector<32x256xf32>, i32 -> vector<32x256xf32>
    %c8 = arith.constant 8 : index
    %c0_46 = arith.constant 0 : index
    %69 = vector.load %arg6[%c8, %c0_46] : memref<9x256xf32, #tpu.memory_space<vmem>>, vector<1x256xf32>
    %70 = vector.broadcast %69 : vector<1x256xf32> to vector<32x256xf32>
    %71 = arith.mulf %68, %70 : vector<32x256xf32>
    %c8_47 = arith.constant 8 : index
    %c0_48 = arith.constant 0 : index
    %c0_49 = arith.constant 0 : index
    %72 = vector.load %arg4[%c8_47, %c0_48, %c0_49] : memref<9x32x32xf32, #tpu.memory_space<vmem>>, vector<1x32x32xf32>
    %73 = vector.shape_cast %72 : vector<1x32x32xf32> to vector<32x32xf32>
    %cst_50 = arith.constant dense<0.000000e+00> : vector<32x256xf32>
    %74 = tpu.matmul %73, %71, %cst_50 {dimension_numbers = #tpu.dot_dimension_numbers<[1], [0], [0], [1], [0, 0, 1, 1], [], []>} : vector<32x32xf32>, vector<32x256xf32>, vector<32x256xf32> -> vector<32x256xf32>
    %75 = arith.addf %67, %74 : vector<32x256xf32>
    %c0_51 = arith.constant 0 : index
    %c0_52 = arith.constant 0 : index
    %76 = vector.load %arg5[%c0_51, %c0_52] : memref<32x1xf32, #tpu.memory_space<vmem>>, vector<32x1xf32>
    %77 = vector.broadcast %76 : vector<32x1xf32> to vector<32x256xf32>
    %78 = arith.addf %75, %77 : vector<32x256xf32>
    %cst_53 = arith.constant 0.000000e+00 : f32
    %79 = vector.broadcast %cst_53 : f32 to vector<32x256xf32>
    %80 = arith.maximumf %78, %79 : vector<32x256xf32>
    %cst_54 = arith.constant dense<0.000000e+00> : vector<32xf32>
    %81 = vector.multi_reduction <add>, %80, %cst_54 [1] : vector<32x256xf32> to vector<32xf32>
    %82 = vector.shape_cast %81 : vector<32xf32> to vector<32x1xf32>
    %cst_55 = arith.constant 2.560000e+02 : f32
    %83 = vector.broadcast %cst_55 : f32 to vector<32x1xf32>
    %84 = arith.divf %82, %83 : vector<32x1xf32>
    %c0_56 = arith.constant 0 : index
    %c0_57 = arith.constant 0 : index
    %85 = vector.load %arg7[%c0_56, %c0_57] : memref<32x8xf32, #tpu.memory_space<vmem>>, vector<32x8xf32>
    %86 = vector.broadcast %84 : vector<32x1xf32> to vector<32x8xf32>
    %87 = arith.mulf %85, %86 : vector<32x8xf32>
    %cst_58 = arith.constant dense<0.000000e+00> : vector<8xf32>
    %88 = vector.multi_reduction <add>, %87, %cst_58 [0] : vector<32x8xf32> to vector<8xf32>
    %89 = vector.shape_cast %88 : vector<8xf32> to vector<1x8xf32>
    %c0_59 = arith.constant 0 : index
    %c0_60 = arith.constant 0 : index
    %90 = vector.load %arg8[%c0_59, %c0_60] : memref<1x8xf32, #tpu.memory_space<vmem>>, vector<1x8xf32>
    %91 = arith.addf %89, %90 : vector<1x8xf32>
    %cst_61 = arith.constant 0.000000e+00 : f32
    %92 = vector.broadcast %cst_61 : f32 to vector<1x8xf32>
    %93 = arith.maximumf %91, %92 : vector<1x8xf32>
    %c0_62 = arith.constant 0 : index
    %c0_63 = arith.constant 0 : index
    %94 = vector.load %arg9[%c0_62, %c0_63] : memref<32x8xf32, #tpu.memory_space<vmem>>, vector<32x8xf32>
    %95 = vector.broadcast %93 : vector<1x8xf32> to vector<32x8xf32>
    %96 = arith.mulf %94, %95 : vector<32x8xf32>
    %cst_64 = arith.constant dense<0.000000e+00> : vector<32xf32>
    %97 = vector.multi_reduction <add>, %96, %cst_64 [1] : vector<32x8xf32> to vector<32xf32>
    %98 = vector.shape_cast %97 : vector<32xf32> to vector<32x1xf32>
    %c0_65 = arith.constant 0 : index
    %c0_66 = arith.constant 0 : index
    %99 = vector.load %arg10[%c0_65, %c0_66] : memref<32x1xf32, #tpu.memory_space<vmem>>, vector<32x1xf32>
    %100 = arith.addf %98, %99 : vector<32x1xf32>
    %101 = arith.negf %100 : vector<32x1xf32>
    %102 = math.exp %101 : vector<32x1xf32>
    %cst_67 = arith.constant 1.000000e+00 : f32
    %103 = vector.broadcast %cst_67 : f32 to vector<32x1xf32>
    %104 = arith.addf %103, %102 : vector<32x1xf32>
    %105 = arith.divf %103, %104 : vector<32x1xf32>
    %106 = vector.broadcast %105 : vector<32x1xf32> to vector<32x256xf32>
    %107 = arith.mulf %80, %106 : vector<32x256xf32>
    %c0_68 = arith.constant 0 : index
    %c0_69 = arith.constant 0 : index
    %108 = vector.load %arg11[%c0_68, %c0_69] : memref<32x32xf32, #tpu.memory_space<vmem>>, vector<32x32xf32>
    %cst_70 = arith.constant dense<0.000000e+00> : vector<32x256xf32>
    %109 = tpu.matmul %108, %107, %cst_70 {dimension_numbers = #tpu.dot_dimension_numbers<[1], [0], [0], [1], [0, 0, 1, 1], [], []>} : vector<32x32xf32>, vector<32x256xf32>, vector<32x256xf32> -> vector<32x256xf32>
    %c0_71 = arith.constant 0 : index
    %c0_72 = arith.constant 0 : index
    %110 = vector.load %arg12[%c0_71, %c0_72] : memref<32x1xf32, #tpu.memory_space<vmem>>, vector<32x1xf32>
    %111 = vector.broadcast %110 : vector<32x1xf32> to vector<32x256xf32>
    %112 = arith.addf %109, %111 : vector<32x256xf32>
    %113 = arith.addf %112, %1 : vector<32x256xf32>
    %cst_73 = arith.constant 0.000000e+00 : f32
    %114 = vector.broadcast %cst_73 : f32 to vector<32x256xf32>
    %115 = arith.maximumf %113, %114 : vector<32x256xf32>
    %c0_74 = arith.constant 0 : index
    %c0_75 = arith.constant 0 : index
    %c0_76 = arith.constant 0 : index
    %116 = vector.load %arg13[%c0_74, %c0_75, %c0_76] : memref<1x32x256xf32, #tpu.memory_space<vmem>>, vector<1x32x256xf32>
    %117 = vector.shape_cast %116 : vector<1x32x256xf32> to vector<32x256xf32>
    %118 = vector.shape_cast %115 : vector<32x256xf32> to vector<1x32x256xf32>
    tpu.vector_store %arg13[%c0_74, %c0_75, %c0_76], %118 {strides = array<i32>} : memref<1x32x256xf32, #tpu.memory_space<vmem>>, vector<1x32x256xf32>,
    return
  }
  func.func @transform_0(%arg0: i32) -> (i32, i32, i32) {
    %c0_i32 = arith.constant 0 : i32
    %c0_i32_0 = arith.constant 0 : i32
    %c0_i32_1 = arith.constant 0 : i32
    return %arg0, %c0_i32, %c0_i32_0 : i32, i32, i32
  }
  func.func @transform_1(%arg0: i32) -> (i32, i32) {
    %c0_i32 = arith.constant 0 : i32
    %c0_i32_0 = arith.constant 0 : i32
    %c0_i32_1 = arith.constant 0 : i32
    return %c0_i32, %c0_i32_0 : i32, i32
  }
  func.func @transform_2(%arg0: i32) -> (i32, i32) {
    %c0_i32 = arith.constant 0 : i32
    %c0_i32_0 = arith.constant 0 : i32
    %c0_i32_1 = arith.constant 0 : i32
    return %c0_i32, %c0_i32_0 : i32, i32
  }
  func.func @transform_3(%arg0: i32) -> (i32, i32, i32) {
    %c0_i32 = arith.constant 0 : i32
    %c0_i32_0 = arith.constant 0 : i32
    %c0_i32_1 = arith.constant 0 : i32
    %c0_i32_2 = arith.constant 0 : i32
    return %c0_i32, %c0_i32_0, %c0_i32_1 : i32, i32, i32
  }
  func.func @transform_4(%arg0: i32) -> (i32, i32) {
    %c0_i32 = arith.constant 0 : i32
    %c0_i32_0 = arith.constant 0 : i32
    %c0_i32_1 = arith.constant 0 : i32
    return %c0_i32, %c0_i32_0 : i32, i32
  }
  func.func @transform_5(%arg0: i32) -> (i32, i32) {
    %c0_i32 = arith.constant 0 : i32
    %c0_i32_0 = arith.constant 0 : i32
    %c0_i32_1 = arith.constant 0 : i32
    return %c0_i32, %c0_i32_0 : i32, i32
  }
  func.func @transform_6(%arg0: i32) -> (i32, i32) {
    %c0_i32 = arith.constant 0 : i32
    %c0_i32_0 = arith.constant 0 : i32
    %c0_i32_1 = arith.constant 0 : i32
    return %c0_i32, %c0_i32_0 : i32, i32
  }
  func.func @transform_7(%arg0: i32) -> (i32, i32) {
    %c0_i32 = arith.constant 0 : i32
    %c0_i32_0 = arith.constant 0 : i32
    %c0_i32_1 = arith.constant 0 : i32
    return %c0_i32, %c0_i32_0 : i32, i32
  }
  func.func @transform_8(%arg0: i32) -> (i32, i32) {
    %c0_i32 = arith.constant 0 : i32
    %c0_i32_0 = arith.constant 0 : i32
    %c0_i32_1 = arith.constant 0 : i32
    return %c0_i32, %c0_i32_0 : i32, i32
  }
  func.func @transform_9(%arg0: i32) -> (i32, i32) {
    %c0_i32 = arith.constant 0 : i32
    %c0_i32_0 = arith.constant 0 : i32
    %c0_i32_1 = arith.constant 0 : i32
    return %c0_i32, %c0_i32_0 : i32, i32
  }
  func.func @transform_10(%arg0: i32) -> (i32, i32) {
    %c0_i32 = arith.constant 0 : i32
    %c0_i32_0 = arith.constant 0 : i32
    %c0_i32_1 = arith.constant 0 : i32
    return %c0_i32, %c0_i32_0 : i32, i32
  }
  func.func @transform_11(%arg0: i32) -> (i32, i32) {
    %c0_i32 = arith.constant 0 : i32
    %c0_i32_0 = arith.constant 0 : i32
    %c0_i32_1 = arith.constant 0 : i32
    return %c0_i32, %c0_i32_0 : i32, i32
  }
  func.func @transform_12(%arg0: i32) -> (i32, i32, i32) {
    %c0_i32 = arith.constant 0 : i32
    %c0_i32_0 = arith.constant 0 : i32
    %c0_i32_1 = arith.constant 0 : i32
    return %arg0, %c0_i32, %c0_i32_0 : i32, i32, i32
  }
}

</mosaic_0001>

<bundles_post_ra>
// kernel: tpu_custom_call.1
= control target key start
LH: loop header
LB: loop body
LE: loop exit
PB: predicated region body
PF: predicated region fallthrough
CT: control target
= control target key end

     0   :  { %17 = vsyncpa [#allocation3], 0  ;;  %s3736_s0 = inlined_call_operand.vmem [shape: f32[2,32,256], index: 0, kind: input, shape index: {}]   ;;  %s3737_s1 = inlined_call_operand.vmem [shape: f32[32,32], index: 1, kind: input, shape index: {}]   ;;  %s3738_s2 = inlined_call_operand.vmem [shape: f32[32,1], index: 2, kind: input, shape index: {}]   ;;  %s3739_s3 = inlined_call_operand.hbm [shape: f32[9,32,32], index: 3, kind: input, shape index: {}]   ;;  %s3740_s4 = inlined_call_operand.vmem [shape: f32[32,1], index: 4, kind: input, shape index: {}]   ;;  %s3741_s5 = inlined_call_operand.vmem [shape: f32[9,256], index: 5, kind: input, shape index: {}]   ;;  %s3742_s6 = inlined_call_operand.vmem [shape: f32[32,8], index: 6, kind: input, shape index: {}]   ;;  %s3743_s7 = inlined_call_operand.hbm [shape: f32[1,8], index: 7, kind: input, shape index: {}]   ;;  %s3744_s8 = inlined_call_operand.vmem [shape: f32[32,8], index: 8, kind: input, shape index: {}]   ;;  %s3745_s9 = inlined_call_operand.vmem [shape: f32[32,1], index: 9, kind: input, shape index: {}]   ;;  %s3746_s10 = inlined_call_operand.vmem [shape: f32[32,32], index: 10, kind: input, shape index: {}]   ;;  %s3747_s11 = inlined_call_operand.vmem [shape: f32[32,1], index: 11, kind: input, shape index: {}]   ;;  %s3748_s12 = inlined_call_operand.hbm [shape: f32[2,32,256], index: 12, kind: output, shape index: {}]  }
   0x1   :  { %18 = vsyncpa [#allocation6], 0 }
   0x2   :  { %19 = vsyncpa [#allocation4], 0 }
   0x3   :  { %21 = vsyncpa [#allocation4 + $0x1], 0  ;;  %s2764_s21 = smov 0   ;;  %s2766_s22 = smov 0  }
   0x4   :  { %s2768_s23 = smov 0   ;;  %s2770_s24 = smov 0  }
   0x5 LB: > { %3756 = sst [smem:[#allocation11_spill]] %s2677_s23  ;;  %s2785_s25 = sadd.s32 4294967295, %s2681_s24   ;;  %s2681_s24 = sphi %s2770_s24, %s3772_s24   ;;  %s2677_s23 = sphi %s2768_s23, %s3774_s23   ;;  %s2673_s22 = sphi %s2766_s22, %s3776_s22   ;;  %s2669_s21 = sphi %s2764_s21, %s3775_s21  }
   0x6   : > { %s2381_s26 = sadd.s32 4294967294, %s2681_s24   ;;  %s2789_s27 = sadd.s32 1, %s2681_s24  }
   0x7   : > { %3757 = sst [smem:[#allocation12_spill]] %s2789_s27  ;;  %s291_s28 = sadd.s32 1, %s2677_s23 }
   0x8   : > { %s288_s29 = ssub.s32 %s2681_s24, %s2789_s27  ;;  %p301_p0 = scmp.ne.s32.totalorder %s2677_s23, %s2673_s22 }
   0x9   : > { %p289_p1 = scmp.eq.s32.totalorder %s288_s29, 0  ;;  %p302_p2 = scmp.eq.s32.totalorder %s2785_s25, 1 }
   0xa   : > { %p307_p3 = scmp.ne.s32.totalorder %s2673_s22, %s2669_s21  ;;  %p308_p4 = scmp.eq.s32.totalorder %s2381_s26, 1 }
   0xb   : > { %s2800_s30 = scalar_select %p289_p1, %s2677_s23, %s291_s28  }
   0xc   : > { %p2802_p5 = por %p302_p2, %p301_p0  ;;  %p2806_p6 = por %p308_p4, %p307_p3 }
   0xd   : > { %3758 = sst [smem:[#allocation13_spill]] %s2800_s30  ;;  %p2382_p7 = scmp.ge.s32.totalorder %s2681_s24, 1 }
   0xe   : > { %p315_p8 = scmp.lt.s32.totalorder %s2681_s24, 3  ;;  %p3750_p9 = scmp.eq.s32.totalorder %s2785_s25, 0 }
   0xf   : > { %s2683_s16 = smov [#allocation2]   ;;  %s2684_s19 = smov [#allocation5]  }
  0x10   : > { %p2813_p10 = pnand %p2382_p7, %p315_p8  ;;  %s333_s17 = sshll.u32 %s2683_s16, 4  ;;  %s334_s17 = int_to_ptr.vmem [resolvable:$true] %s333_s17 }
  0x11   : > { %s356_s20 = sshll.u32 %s2684_s19, 4  ;;  %s2572_s26 = scalar_lea.vmem %s334_s17, 4608  ;;  %s357_s20 = int_to_ptr.vmem [resolvable:$true] %s356_s20 }
  0x12   : > { %p2472_p11 = pneg %p2813_p10  ;;  %p2573_p0 = scmp.ne.s32.totalorder %s334_s17, %s2572_s26 }
  0x13   : > { %p2580_p3 = scmp.lt.s32.totalorder %s334_s17, %s334_s17  ;;  %p2581_p4 = scmp.lt.s32.totalorder %s2572_s26, %s2572_s26 }
  0x14   : > { %p2821_p12 = pnand %p3750_p9, %p2472_p11 }
  0x15   : > { %p2582_p7 = por %p2581_p4, %p2580_p3 }
  0x16   : > { %p2563_p13 = pneg %p2821_p12 }
  0x18   : > { %p2575_p1 = pnand %p2573_p0, %p2563_p13 }
  0x1a   : > { %p2576_p2 = pneg %p2575_p1 }
  0x1c   : > { %p2583_p8 = pnand %p2582_p7, %p2576_p2 }
  0x1e   : > { %2586 = shalt.err (!%p2583_p8)
}
  0x1f   : > { %s2685_s28 = smov 128   ;;  %s2686_s29 = smov 8  }
  0x20   : > { %2475 = dma.hbm_to_vmem [thread:$0]  (!%p2821_p12), %s3739_s3, 4608, %s334_s17, [#allocation3], %s2685_s28, %s2685_s28, %s2686_s29  }
  0x21   : > { %s2598_s30 = scalar_lea.vmem %s357_s20, 16  ;;  %s2605_s23 = scalar_lea.vmem %s357_s20, 32 }
  0x22   : > { %p2599_p11 = scmp.ne.s32.totalorder %s357_s20, %s2598_s30  ;;  %p2606_p9 = scmp.lt.s32.totalorder %s357_s20, %s357_s20 }
  0x23   : > { %p2607_p3 = scmp.lt.s32.totalorder %s2605_s23, %s2598_s30 }
  0x24   : > { %p2601_p0 = pnand %p2599_p11, %p2563_p13 }
  0x25   : > { %p2608_p2 = por %p2607_p3, %p2606_p9 }
  0x26   : > { %p2602_p1 = pneg %p2601_p0 }
  0x28   : > { %p2609_p4 = pnand %p2608_p2, %p2602_p1 }
  0x2a   : > { %2612 = shalt.err (!%p2609_p4)
}
  0x2b   : > { %2478 = dma.hbm_to_vmem [thread:$0]  (!%p2821_p12), %s3743_s7, 16, %s357_s20, [#allocation6]  }
  0x2c   : > { %389 = sbr.rel (%p2813_p10) target bundleno = 1429 (0x595), region = 68 }
  0x31   : > { %p3763_p7 = scmp.eq.s32.totalorder %s2785_s25, 0 }
  0x33   : > { %2656 = dma.done.wait (%p3763_p7), [#allocation3], 4608   ;;  %p3764_p13 = pmov %p3763_p7 }
  0x34   : > { %p3765_p8 = pmov %p3763_p7 }
  0x35   : > { %2658 = vsyncadd (%p3764_p13), [#allocation3], 4294962688 }
  0x36   : > { %2660 = dma.done.wait (%p3765_p8), [#allocation6], 16   ;;  %p3766_p9 = pmov %p3763_p7 }
  0x37   : > { %p435_p11 = scmp.lt.s32.totalorder %s2785_s25, 1  ;;  %v3753_v0 = vmov 0.0   ;;  %v2688_v1 = vmov 0   ;;  %v448_v10 = vld [vmem:[%s3737_s1] sm:$0xff]  ;;  %vm476_vm0 = vcmask 261120   ;;  %v450_v11 = vld [vmem:[%s3737_s1 + $0x10] sm:$0xff] }
  0x38   : > { %2662 = vsyncadd (%p3766_p9), [#allocation6], 4294967280  ;;  %553 = vmatprep.mubr.f32.mxu0 %v3753_v0  ;;  %565 = vmatprep.mubr.f32.mxu1 %v3753_v0  ;;  %v455_v12 = vld [vmem:[%s3738_s2 + $0x18] sm:$0xff]  ;;  %v453_v13 = vld [vmem:[%s3738_s2 + $0x8] sm:$0xff]  ;;  %s2689_s19 = smov 17   ;;  %s2690_s26 = smov 16  }
  0x39   : > { %s436_s23 = scalar_select %p435_p11, %s2785_s25, 1  ;;  %2535 = vset.pattern.permute.xlu0 %v2688_v1  ;;  %2536 = vset.pattern.permute.xlu1 %v2688_v1  ;;  %v449_v14 = vld [vmem:[%s3737_s1 + $0x8] sm:$0xff]  ;;  %v451_v15 = vld [vmem:[%s3737_s1 + $0x18] sm:$0xff]  ;;  %v454_v16 = vld [vmem:[%s3738_s2 + $0x10] sm:$0xff]  ;;  %vm2029_vm9 = vcmask 64512  }
  0x3a   : > { %473 = vperm.xlu0 %2535, %v455_v12   ;;  %463 = vperm.xlu1 %2536, %v453_v13   ;;  %v452_v17 = vld [vmem:[%s3738_s2] sm:$0xff]  ;;  %s2693_s30 = smov 127   ;;  %s2694_s15 = smov 113   ;;  %v588_v47 = vld [vmem:[#allocation2 + $0x88] sm:$0xff]  ;;  %v589_v48 = vld [vmem:[#allocation2 + $0x90] sm:$0xff] }
  0x3b   : > { %s2452_s27 = sshll.u32 %s436_s23, 6  ;;  %s2691_s23 = smov 15   ;;  %v587_v46 = vld [vmem:[#allocation2 + $0x80] sm:$0xff]  ;;  %v590_v49 = vld [vmem:[#allocation2 + $0x98] sm:$0xff]  ;;  %v1965_v58 = vld [vmem:[%s3740_s4 + $0x8] sm:$0xff] }
  0x3c   : > { %s2860_s17 = scalar_lea.vmem %s3736_s0, %s2452_s27  ;;  %s2692_s27 = smov 1   ;;  %v1964_v56 = vld [vmem:[%s3740_s4] sm:$0xff]  ;;  %v1966_v60 = vld [vmem:[%s3740_s4 + $0x10] sm:$0xff]  ;;  %v1967_v62 = vld [vmem:[%s3740_s4 + $0x18] sm:$0xff] }
  0x3d   : > { %v447_v2 = vld [vmem:[%s2860_s17 + $0x38] sm:$0xff]  ;;  %v446_v3 = vld [vmem:[%s2860_s17 + $0x30] sm:$0xff]  ;;  %v445_v4 = vld [vmem:[%s2860_s17 + $0x28] sm:$0xff]  ;;  %s2695_s18 = smov 112   ;;  %s2696_s20 = smov 111  }
  0x3e   : > { %513 = vmatprep.subr.mxu0 %v447_v2  ;;  %2454 = vmatprep.subr.mxu1 %v447_v2  ;;  %v444_v5 = vld [vmem:[%s2860_s17 + $0x20] sm:$0xff]  ;;  %v443_v6 = vld [vmem:[%s2860_s17 + $0x18] sm:$0xff]  ;;  %v442_v7 = vld [vmem:[%s2860_s17 + $0x10] sm:$0xff] }
  0x3f   : > { %514 = vmatpush1.msra.mxu0 %v446_v3  ;;  %2458 = vmatpush1.msra.mxu1 %v446_v3  ;;  %v441_v8 = vld [vmem:[%s2860_s17 + $0x8] sm:$0xff]  ;;  %v440_v9 = vld [vmem:[%s2860_s17] sm:$0xff] }
  0x40   : > { %515 = vmatprep.subr.mxu0 %v445_v4  ;;  %2455 = vmatprep.subr.mxu1 %v445_v4  ;;  %v607_v4 = vlaneseq }
  0x41   : > { %516 = vmatpush1.msra.mxu0 %v444_v5  ;;  %2459 = vmatpush1.msra.mxu1 %v444_v5 }
  0x42   : > { %517 = vmatprep.subr.mxu0 %v443_v6  ;;  %2456 = vmatprep.subr.mxu1 %v443_v6  ;;  %v3102_v6 = vand.u32 127, %v607_v4 }
  0x43   : > { %518 = vmatpush1.msra.mxu0 %v442_v7  ;;  %2460 = vmatpush1.msra.mxu1 %v442_v7 }
  0x44   : > { %519 = vmatprep.subr.mxu0 %v441_v8  ;;  %2457 = vmatprep.subr.mxu1 %v441_v8  ;;  %vm1180_vm1 = vcmp.lt.s32.totalorder %v3102_v6, 1  ;;  %vm1340_vm2 = vcmp.lt.s32.totalorder %v3102_v6, 127  ;;  %vm1500_vm3 = vcmp.lt.s32.totalorder %v3102_v6, 113  ;;  %vm1660_vm4 = vcmp.lt.s32.totalorder %v3102_v6, 112 }
  0x45   : > { %520 = vmatpush1.msra.mxu0 %v440_v9  ;;  %2461 = vmatpush1.msra.mxu1 %v440_v9  ;;  %vm609_vm5 = vcmp.lt.s32.totalorder %v3102_v6, 17  ;;  %vm860_vm6 = vcmp.lt.s32.totalorder %v3102_v6, 16  ;;  %vm1020_vm7 = vcmp.lt.s32.totalorder %v3102_v6, 15  ;;  %vm1820_vm8 = vcmp.lt.s32.totalorder %v3102_v6, 111  ;;  %v1693_v6 = vld [vmem:[#allocation2 + $0xf0] sm:$0xff] }
  0x46   : > { %2392 = vmatmul.mubr.msk.f32.vlgmr.msra.gmra.mxu0 %vm476_vm0, %v448_v10  ;;  %2394 = vmatmul.mubr.msk.f32.vlgmr.msra.gmra.mxu1 %vm476_vm0, %v450_v11 }
  0x47   : > { %559 = vmatprep.mubr.f32.mxu0 %v3753_v0  ;;  %571 = vmatprep.mubr.f32.mxu1 %v3753_v0 }
  0x48   : > { %468 = vperm.xlu0 %2535, %v454_v16   ;;  %458 = vperm.xlu1 %2536, %v452_v17  }
  0x4a   : > { %2393 = vmatmul.mubr.msk.f32.gmra.mxu0 %vm476_vm0, %v449_v14  ;;  %2395 = vmatmul.mubr.msk.f32.gmra.mxu1 %vm476_vm0, %v451_v15 }
  0x4b   : > { %718 = vmatprep.mubr.f32.mxu1 %v3753_v0  ;;  %819 = vmatprep.mubr.f32.mxu0 %v3753_v0 }
  0xb5   : > { %v474_v18 = vpop.permute.xlu0 %473  ;;  %v464_v19 = vpop.permute.xlu1 %463 }
  0xc3   : > { %v469_v20 = vpop.permute.xlu0 %468  ;;  %v459_v21 = vpop.permute.xlu1 %458 }
 0x106   : > { %v555_v22 = vpop.f32.mrf.mxu0  ;;  %v567_v23 = vpop.f32.mrf.mxu1 }
 0x107   : > { %v568_v24 = vadd.f32 %v567_v23, %v469_v20  ;;  %v556_v28 = vadd.f32 %v555_v22, %v459_v21 }
 0x108   : > { %v557_v25 = vpop.f32.mrf.mxu0  ;;  %v569_v26 = vpop.f32.mrf.mxu1 }
 0x109   : > { %v2902_v27 = vmax.f32 %v568_v24, 0.0  ;;  %v570_v29 = vadd.f32 %v569_v26, %v469_v20  ;;  %v558_v32 = vadd.f32 %v557_v25, %v459_v21  ;;  %v2908_v37 = vmax.f32 %v556_v28, 0.0 }
 0x10a   : > { %v561_v30 = vpop.f32.mrf.mxu0  ;;  %v573_v31 = vpop.f32.mrf.mxu1  ;;  %v621_v20 = vshrl.u32 %v607_v4, 7 }
 0x10b   : > { %v2904_v33 = vmax.f32 %v570_v29, 0.0  ;;  %595 = vrot.lane.b32.xlu0 %v2902_v27, %s2689_s19  ;;  %v574_v34 = vadd.f32 %v573_v31, %v474_v18  ;;  %v2912_v39 = vmax.f32 %v558_v32, 0.0  ;;  %v562_v42 = vadd.f32 %v561_v30, %v464_v19 }
 0x10c   : > { %v563_v35 = vpop.f32.mrf.mxu0  ;;  %v575_v36 = vpop.f32.mrf.mxu1  ;;  %v3160_v24 = vsub.s32 0, %v621_v20  ;;  %v3162_v25 = vsub.s32 1, %v621_v20 }
 0x10d   : > { %v576_v38 = vadd.f32 %v575_v36, %v474_v18  ;;  %603 = vrot.lane.b32.xlu1 %v2904_v33, %s2689_s19  ;;  %v564_v40 = vadd.f32 %v563_v35, %v464_v19  ;;  %v2918_v43 = vmax.f32 %v574_v34, 0.0  ;;  %v2929_v45 = vmax.f32 %v562_v42, 0.0 }
 0x10e   : > { %3767 = vst [vmem:[#allocation14_spill] sm:$0xff] %v3160_v24 }
 0x10f   : > { %v2914_v41 = vmax.f32 %v576_v38, 0.0  ;;  %591 = vrot.lane.b32.xlu0 %v2908_v37, %s2689_s19  ;;  %v2924_v44 = vmax.f32 %v564_v40, 0.0 }
 0x111   : > { %779 = vmatprep.subr.mxu0 %v2914_v41  ;;  %599 = vrot.lane.b32.xlu1 %v2912_v39, %s2689_s19 }
 0x112   : > { %780 = vmatpush1.msra.mxu0 %v2918_v43 }
 0x113   : > { %781 = vmatprep.subr.mxu0 %v2904_v33  ;;  %848 = vrot.lane.b32.xlu0 %v2902_v27, %s2690_s26 }
 0x114   : > { %782 = vmatpush1.msra.mxu0 %v2902_v27 }
 0x115   : > { %783 = vmatprep.subr.mxu0 %v2924_v44  ;;  %856 = vrot.lane.b32.xlu1 %v2904_v33, %s2690_s26 }
 0x116   : > { %784 = vmatpush1.msra.mxu0 %v2929_v45 }
 0x117   : > { %785 = vmatprep.subr.mxu0 %v2912_v39  ;;  %844 = vrot.lane.b32.xlu0 %v2908_v37, %s2690_s26 }
 0x118   : > { %786 = vmatpush1.msra.mxu0 %v2908_v37 }
 0x119   : > { %852 = vrot.lane.b32.xlu1 %v2912_v39, %s2690_s26  ;;  %2400 = vmatmul.mubr.msk.f32.vlgmr.msra.gmra.mxu0 %vm476_vm0, %v587_v46 }
 0x11a   : > { %825 = vmatprep.mubr.f32.mxu0 %v3753_v0 }
 0x11b   : > { %1008 = vrot.lane.b32.xlu0 %v2902_v27, %s2691_s23 }
 0x11d   : > { %1016 = vrot.lane.b32.xlu1 %v2904_v33, %s2691_s23  ;;  %2401 = vmatmul.mubr.msk.f32.gmra.mxu0 %vm476_vm0, %v588_v47 }
 0x11e   : > { %831 = vmatprep.mubr.f32.mxu0 %v3753_v0 }
 0x11f   : > { %1168 = vrot.lane.b32.xlu0 %v2902_v27, %s2692_s27 }
 0x121   : > { %1176 = vrot.lane.b32.xlu1 %v2904_v33, %s2692_s27  ;;  %2402 = vmatmul.mubr.msk.f32.gmra.mxu0 %vm476_vm0, %v589_v48 }
 0x122   : > { %837 = vmatprep.mubr.f32.mxu0 %v3753_v0 }
 0x123   : > { %1004 = vrot.lane.b32.xlu0 %v2908_v37, %s2691_s23 }
 0x125   : > { %1012 = vrot.lane.b32.xlu1 %v2912_v39, %s2691_s23  ;;  %2403 = vmatmul.mubr.msk.f32.gmra.mxu0 %vm476_vm0, %v590_v49 }
 0x126   : > { %1131 = vmatprep.mubr.f32.mxu0 %v3753_v0 }
 0x127   : > { %1164 = vrot.lane.b32.xlu0 %v2908_v37, %s2692_s27 }
 0x129   : > { %1172 = vrot.lane.b32.xlu1 %v2912_v39, %s2692_s27 }
 0x12b   : > { %1328 = vrot.lane.b32.xlu0 %v2902_v27, %s2693_s30 }
 0x12d   : > { %1336 = vrot.lane.b32.xlu1 %v2904_v33, %s2693_s30 }
 0x12f   : > { %1488 = vrot.lane.b32.xlu0 %v2902_v27, %s2694_s15 }
 0x131   : > { %1496 = vrot.lane.b32.xlu1 %v2904_v33, %s2694_s15 }
 0x133   : > { %1324 = vrot.lane.b32.xlu0 %v2908_v37, %s2693_s30 }
 0x135   : > { %1332 = vrot.lane.b32.xlu1 %v2912_v39, %s2693_s30 }
 0x137   : > { %1484 = vrot.lane.b32.xlu0 %v2908_v37, %s2694_s15 }
 0x139   : > { %1492 = vrot.lane.b32.xlu1 %v2912_v39, %s2694_s15 }
 0x13b   : > { %1648 = vrot.lane.b32.xlu0 %v2902_v27, %s2695_s18 }
 0x13d   : > { %1656 = vrot.lane.b32.xlu1 %v2904_v33, %s2695_s18 }
 0x13f   : > { %597 = vrot.lane.b32.xlu0 %v2918_v43, %s2689_s19 }
 0x141   : > { %605 = vrot.lane.b32.xlu1 %v2914_v41, %s2689_s19 }
 0x143   : > { %593 = vrot.lane.b32.xlu0 %v2929_v45, %s2689_s19 }
 0x145   : > { %601 = vrot.lane.b32.xlu1 %v2924_v44, %s2689_s19 }
 0x147   : > { %1808 = vrot.lane.b32.xlu0 %v2902_v27, %s2696_s20  ;;  %v618_v27 = vld [vmem:[%s3741_s5] ss:$8 sm:$0x3] }
 0x148   : > { %v623_v30 = vrot.slane %v618_v27, %v3160_v24  ;;  %v627_v31 = vrot.slane %v618_v27, %v3162_v25 }
 0x149   : > { %1816 = vrot.lane.b32.xlu1 %v2904_v33, %s2696_s20 }
 0x14b   : > { %850 = vrot.lane.b32.xlu0 %v2918_v43, %s2690_s26 }
 0x14d   : > { %1652 = vrot.lane.b32.xlu1 %v2912_v39, %s2695_s18 }
 0x14f   : > { %846 = vrot.lane.b32.xlu0 %v2929_v45, %s2690_s26 }
 0x151   : > { %858 = vrot.lane.b32.xlu1 %v2914_v41, %s2690_s26 }
 0x153   : > { %1010 = vrot.lane.b32.xlu0 %v2918_v43, %s2691_s23 }
 0x155   : > { %854 = vrot.lane.b32.xlu1 %v2924_v44, %s2690_s26 }
 0x157   : > { %1170 = vrot.lane.b32.xlu0 %v2918_v43, %s2692_s27 }
 0x159   : > { %1018 = vrot.lane.b32.xlu1 %v2914_v41, %s2691_s23 }
 0x15b   : > { %1006 = vrot.lane.b32.xlu0 %v2929_v45, %s2691_s23 }
 0x15d   : > { %1178 = vrot.lane.b32.xlu1 %v2914_v41, %s2692_s27 }
 0x15f   : > { %1166 = vrot.lane.b32.xlu0 %v2929_v45, %s2692_s27 }
 0x161   : > { %1014 = vrot.lane.b32.xlu1 %v2924_v44, %s2691_s23  ;;  %s432_s23 = sand.u32 1, %s2673_s22  }
 0x162   : > { %s3695_s16 = scalar_lea.sflag [#allocation4], %s432_s23 }
 0x163   : > { %1330 = vrot.lane.b32.xlu0 %v2918_v43, %s2693_s30 }
 0x165   : > { %1174 = vrot.lane.b32.xlu1 %v2924_v44, %s2692_s27  ;;  %s2389_s27 = sshll.u32 %s432_s23, 6 }
 0x167   : > { %1490 = vrot.lane.b32.xlu0 %v2918_v43, %s2694_s15 }
 0x169   : > { %1338 = vrot.lane.b32.xlu1 %v2914_v41, %s2693_s30 }
 0x16b   : > { %1326 = vrot.lane.b32.xlu0 %v2929_v45, %s2693_s30 }
 0x16d   : > { %1498 = vrot.lane.b32.xlu1 %v2914_v41, %s2694_s15 }
 0x16f   : > { %1486 = vrot.lane.b32.xlu0 %v2929_v45, %s2694_s15 }
 0x171   : > { %1334 = vrot.lane.b32.xlu1 %v2924_v44, %s2693_s30  ;;  %s3668_s30 = scalar_lea.vmem [#allocation7], %s2389_s27 }
 0x173   : > { %1650 = vrot.lane.b32.xlu0 %v2918_v43, %s2695_s18 }
 0x175   : > { %1494 = vrot.lane.b32.xlu1 %v2924_v44, %s2694_s15  ;;  %s2297_s15 = sshll.u32 %s3668_s30, 4  ;;  %s3684_s15 = int_to_ptr.vmem [resolvable:$true] %s2297_s15 }
 0x177   : > { %1810 = vrot.lane.b32.xlu0 %v2918_v43, %s2696_s20 }
 0x179   : > { %1658 = vrot.lane.b32.xlu1 %v2914_v41, %s2695_s18 }
 0x17b   : > { %1646 = vrot.lane.b32.xlu0 %v2929_v45, %s2695_s18 }
 0x17d   : > { %v3048_v50 = vpop.permute.xlu0 %595  ;;  %1818 = vrot.lane.b32.xlu1 %v2914_v41, %s2696_s20 }
 0x17f   : > { %v3052_v51 = vpop.permute.xlu1 %603  ;;  %1644 = vrot.lane.b32.xlu0 %v2908_v37, %s2695_s18 }
 0x180   : > { %v612_v33 = vsel %vm609_vm5, %v3048_v50, %v3052_v51  ;;  %v616_v36 = vsel %vm609_vm5, %v3052_v51, %v3048_v50 }
 0x181   : > { %1654 = vrot.lane.b32.xlu1 %v2924_v44, %s2695_s18  ;;  %v3058_v52 = vpop.permute.xlu0 %591  ;;  %v635_v40 = vmul.f32 %v627_v31, %v612_v33  ;;  %v634_v42 = vmul.f32 %v623_v30, %v616_v36  ;;  %s2453_s18 = sshll.u32 %s2785_s25, 10  ;;  %s2613_s25 = scalar_lea.vmem %s3684_s15, 1024 }
 0x182   : > { %s3690_s29 = scalar_lea.hbm %s3748_s12, %s2453_s18  ;;  %p2614_p10 = scmp.ne.s32.totalorder %s3684_s15, %s2613_s25 }
 0x183   : > { %v3060_v53 = vpop.permute.xlu1 %599  ;;  %1806 = vrot.lane.b32.xlu0 %v2929_v45, %s2696_s20 }
 0x184   : > { %v610_v43 = vsel %vm609_vm5, %v3058_v52, %v3060_v53  ;;  %v614_v46 = vsel %vm609_vm5, %v3060_v53, %v3058_v52  ;;  %v2404_v52 = vld [vmem:[%s3741_s5 + $0x1] ss:$8 sm:$0x3]  ;;  %p2615_p12 = pnand %p2614_p10, %p2802_p5 }
 0x185   : > { %1814 = vrot.lane.b32.xlu1 %v2924_v44, %s2696_s20  ;;  %v3066_v54 = vpop.permute.xlu0 %848  ;;  %v631_v50 = vmul.f32 %v627_v31, %v610_v43  ;;  %v639_v53 = vld [vmem:[#allocation2 + $0x8] sm:$0xff]  ;;  %v875_v20 = vrot.slane %v2404_v52, %v3160_v24  ;;  %v879_v27 = vrot.slane %v2404_v52, %v3162_v25 }
 0x186   : > { %p2616_p0 = pneg %p2615_p12 }
 0x187   : > { %v3068_v55 = vpop.permute.xlu1 %856  ;;  %1804 = vrot.lane.b32.xlu0 %v2908_v37, %s2696_s20 }
 0x189   : > { %1812 = vrot.lane.b32.xlu1 %v2912_v39, %s2696_s20  ;;  %v3077_v57 = vpop.permute.xlu0 %844 }
 0x18b   : > { %v3082_v59 = vpop.permute.xlu1 %852  ;;  %1970 = vperm.xlu0 %2535, %v1964_v56   ;;  %v630_v56 = vmul.f32 %v623_v30, %v614_v46 }
 0x18d   : > { %1975 = vperm.xlu1 %2536, %v1965_v58   ;;  %v3087_v61 = vpop.permute.xlu0 %1008  ;;  %v638_v58 = vld [vmem:[#allocation2] sm:$0xff] }
 0x18f   : > { %v3092_v63 = vpop.permute.xlu1 %1016  ;;  %1980 = vperm.xlu0 %2535, %v1966_v60  }
 0x190   : > { %v1027_v52 = vsel %vm1020_vm7, %v3092_v63, %v3087_v61 }
 0x191   : > { %1985 = vperm.xlu1 %2536, %v1967_v62   ;;  %v3094_v1 = vpop.permute.xlu0 %1168 }
 0x193   : > { %v3096_v2 = vpop.permute.xlu1 %1176 }
 0x195   : > { %v3098_v3 = vpop.permute.xlu0 %1004 }
 0x197   : > { %v3100_v5 = vpop.permute.xlu1 %1012 }
 0x199   : > { %v3104_v7 = vpop.permute.xlu0 %1164 }
 0x19b   : > { %v3107_v8 = vpop.permute.xlu1 %1172 }
 0x19c   : > { %v3113_v9 = vsel %vm1180_vm1, %v3107_v8, %v3104_v7 }
 0x19d   : > { %v3115_v10 = vpop.permute.xlu0 %1328 }
 0x19f   : > { %v3118_v11 = vpop.permute.xlu1 %1336 }
 0x1a0   : > { %v3124_v12 = vsel %vm1340_vm2, %v3115_v10, %v3118_v11 }
 0x1a1   : > { %v3126_v13 = vpop.permute.xlu0 %1488 }
 0x1a3   : > { %v3129_v14 = vpop.permute.xlu1 %1496 }
 0x1a4   : > { %v3135_v15 = vsel %vm1500_vm3, %v3126_v13, %v3129_v14 }
 0x1a5   : > { %v3137_v16 = vpop.permute.xlu0 %1324 }
 0x1a7   : > { %v3139_v17 = vpop.permute.xlu1 %1332 }
 0x1a8   : > { %v3145_v18 = vsel %vm1340_vm2, %v3137_v16, %v3139_v17 }
 0x1a9   : > { %v3147_v19 = vpop.permute.xlu0 %1484 }
 0x1ab   : > { %v3149_v21 = vpop.permute.xlu1 %1492 }
 0x1ac   : > { %v3155_v22 = vsel %vm1500_vm3, %v3147_v19, %v3149_v21 }
 0x1ad   : > { %v3157_v23 = vpop.permute.xlu0 %1648 }
 0x1af   : > { %v3164_v26 = vpop.permute.xlu1 %1656 }
 0x1b0   : > { %v3173_v28 = vsel %vm1660_vm4, %v3157_v23, %v3164_v26 }
 0x1b1   : > { %v598_v29 = vpop.permute.xlu0 %597 }
 0x1b3   : > { %v606_v32 = vpop.permute.xlu1 %605 }
 0x1b4   : > { %v613_v34 = vsel %vm609_vm5, %v598_v29, %v606_v32  ;;  %v617_v35 = vsel %vm609_vm5, %v606_v32, %v598_v29 }
 0x1b5   : > { %v636_v37 = vmul.f32 %v623_v30, %v617_v35  ;;  %v637_v38 = vmul.f32 %v627_v31, %v613_v34  ;;  %v594_v39 = vpop.permute.xlu0 %593  ;;  %v640_v34 = vld [vmem:[#allocation2 + $0x10] sm:$0xff] }
 0x1b7   : > { %v602_v41 = vpop.permute.xlu1 %601  ;;  %678 = vmatprep.subr.mxu1 %v637_v38 }
 0x1b8   : > { %v611_v44 = vsel %vm609_vm5, %v594_v39, %v602_v41  ;;  %v615_v45 = vsel %vm609_vm5, %v602_v41, %v594_v39  ;;  %679 = vmatpush1.msra.mxu1 %v636_v37  ;;  %v865_v41 = vsel %vm860_vm6, %v3082_v59, %v3077_v57 }
 0x1b9   : > { %v632_v47 = vmul.f32 %v623_v30, %v615_v45  ;;  %v633_v48 = vmul.f32 %v627_v31, %v611_v44  ;;  %680 = vmatprep.subr.mxu1 %v635_v40  ;;  %v3202_v49 = vpop.permute.xlu0 %1808  ;;  %v863_v30 = vsel %vm860_vm6, %v3066_v54, %v3068_v55  ;;  %v867_v31 = vsel %vm860_vm6, %v3068_v55, %v3066_v54  ;;  %v2409_v54 = vld [vmem:[%s3741_s5 + $0x2] ss:$8 sm:$0x3]  ;;  %v641_v44 = vld [vmem:[#allocation2 + $0x18] sm:$0xff] }
 0x1ba   : > { %681 = vmatpush1.msra.mxu1 %v634_v42  ;;  %v886_v38 = vmul.f32 %v875_v20, %v867_v31  ;;  %v887_v39 = vmul.f32 %v879_v27, %v863_v30  ;;  %v861_v40 = vsel %vm860_vm6, %v3077_v57, %v3082_v59  ;;  %v1039_v57 = vrot.slane %v2409_v54, %v3162_v25 }
 0x1bb   : > { %v3204_v51 = vpop.permute.xlu1 %1816  ;;  %682 = vmatprep.subr.mxu1 %v633_v48  ;;  %v1035_v48 = vrot.slane %v2409_v54, %v3160_v24  ;;  %v882_v59 = vmul.f32 %v875_v20, %v865_v41 }
 0x1bc   : > { %683 = vmatpush1.msra.mxu1 %v632_v47 }
 0x1bd   : > { %684 = vmatprep.subr.mxu1 %v631_v50  ;;  %v851_v60 = vpop.permute.xlu0 %850  ;;  %v883_v50 = vmul.f32 %v879_v27, %v861_v40 }
 0x1be   : > { %685 = vmatpush1.msra.mxu1 %v630_v56  ;;  %v1023_v56 = vsel %vm1020_vm7, %v3087_v61, %v3092_v63  ;;  %v1046_v61 = vmul.f32 %v1035_v48, %v1027_v52  ;;  %v1051_v52 = vld [vmem:[#allocation2 + $0x40] sm:$0xff] }
 0x1bf   : > { %v3206_v62 = vpop.permute.xlu1 %1652  ;;  %2396 = vmatmul.mubr.msk.f32.vlgmr.msra.gmra.mxu1 %vm476_vm0, %v638_v58  ;;  %v2414_v58 = vld [vmem:[%s3741_s5 + $0x3] ss:$8 sm:$0x3]  ;;  %v1047_v63 = vmul.f32 %v1039_v57, %v1023_v56 }
 0x1c0   : > { %724 = vmatprep.mubr.f32.mxu1 %v3753_v0  ;;  %v3268_v31 = vrot.slane %v2414_v58, %v3160_v24 }
 0x1c1   : > { %v847_v4 = vpop.permute.xlu0 %846 }
 0x1c3   : > { %v859_v29 = vpop.permute.xlu1 %858  ;;  %2397 = vmatmul.mubr.msk.f32.gmra.mxu1 %vm476_vm0, %v639_v53 }
 0x1c4   : > { %v864_v32 = vsel %vm860_vm6, %v851_v60, %v859_v29  ;;  %v868_v33 = vsel %vm860_vm6, %v859_v29, %v851_v60  ;;  %730 = vmatprep.mubr.f32.mxu1 %v3753_v0 }
 0x1c5   : > { %v888_v35 = vmul.f32 %v875_v20, %v868_v33  ;;  %v889_v36 = vmul.f32 %v879_v27, %v864_v32  ;;  %v1011_v37 = vpop.permute.xlu0 %1010  ;;  %v1199_v32 = vrot.slane %v2414_v58, %v3162_v25  ;;  %v1183_v33 = vsel %vm1180_vm1, %v3094_v1, %v3096_v2 }
 0x1c7   : > { %v855_v55 = vpop.permute.xlu1 %854  ;;  %2398 = vmatmul.mubr.msk.f32.gmra.mxu1 %vm476_vm0, %v640_v34  ;;  %931 = vmatprep.subr.mxu1 %v889_v36  ;;  %v1207_v41 = vmul.f32 %v1199_v32, %v1183_v33  ;;  %v1052_v33 = vld [vmem:[#allocation2 + $0x48] sm:$0xff] }
 0x1c8   : > { %v862_v42 = vsel %vm860_vm6, %v847_v4, %v855_v55  ;;  %v866_v43 = vsel %vm860_vm6, %v855_v55, %v847_v4  ;;  %932 = vmatpush1.msra.mxu1 %v888_v35  ;;  %736 = vmatprep.mubr.f32.mxu1 %v3753_v0  ;;  %v1187_v35 = vsel %vm1180_vm1, %v3096_v2, %v3094_v1 }
 0x1c9   : > { %v884_v45 = vmul.f32 %v875_v20, %v866_v43  ;;  %v885_v46 = vmul.f32 %v879_v27, %v862_v42  ;;  %933 = vmatprep.subr.mxu1 %v887_v39  ;;  %v1171_v47 = vpop.permute.xlu0 %1170  ;;  %v891_v20 = vld [vmem:[#allocation2 + $0x20] sm:$0xff]  ;;  %v1206_v55 = vmul.f32 %v3268_v31, %v1187_v35  ;;  %v1021_v1 = vsel %vm1020_vm7, %v3098_v3, %v3100_v5 }
 0x1ca   : > { %934 = vmatpush1.msra.mxu1 %v886_v38  ;;  %v892_v38 = vld [vmem:[#allocation2 + $0x28] sm:$0xff]  ;;  %v1025_v42 = vsel %vm1020_vm7, %v3100_v5, %v3098_v3  ;;  %v1043_v56 = vmul.f32 %v1039_v57, %v1021_v1  ;;  %v1181_v3 = vsel %vm1180_vm1, %v3104_v7, %v3107_v8 }
 0x1cb   : > { %v1019_v60 = vpop.permute.xlu1 %1018  ;;  %2399 = vmatmul.mubr.msk.f32.gmra.mxu1 %vm476_vm0, %v641_v44  ;;  %935 = vmatprep.subr.mxu1 %v885_v46  ;;  %v2419_v5 = vld [vmem:[%s3741_s5 + $0x5] ss:$8 sm:$0x3]  ;;  %v1203_v7 = vmul.f32 %v1199_v32, %v1181_v3  ;;  %v2429_v3 = vld [vmem:[%s3741_s5 + $0x7] ss:$8 sm:$0x3] }
 0x1cc   : > { %v1024_v53 = vsel %vm1020_vm7, %v1011_v37, %v1019_v60  ;;  %v1028_v4 = vsel %vm1020_vm7, %v1019_v60, %v1011_v37  ;;  %936 = vmatpush1.msra.mxu1 %v884_v45  ;;  %971 = vmatprep.mubr.f32.mxu1 %v3753_v0  ;;  %v893_v45 = vld [vmem:[#allocation2 + $0x30] sm:$0xff]  ;;  %v3316_v8 = vrot.slane %v2419_v5, %v3160_v24 }
 0x1cd   : > { %v1048_v27 = vmul.f32 %v1035_v48, %v1028_v4  ;;  %v1049_v29 = vmul.f32 %v1039_v57, %v1024_v53  ;;  %937 = vmatprep.subr.mxu1 %v883_v50  ;;  %v1007_v30 = vpop.permute.xlu0 %1006  ;;  %v1042_v50 = vmul.f32 %v1035_v48, %v1025_v42 }
 0x1ce   : > { %938 = vmatpush1.msra.mxu1 %v882_v59 }
 0x1cf   : > { %v1179_v34 = vpop.permute.xlu1 %1178  ;;  %2405 = vmatmul.mubr.msk.f32.vlgmr.msra.gmra.mxu1 %vm476_vm0, %v891_v20  ;;  %1091 = vmatprep.subr.mxu0 %v1049_v29 }
 0x1d0   : > { %v1184_v36 = vsel %vm1180_vm1, %v1171_v47, %v1179_v34  ;;  %v1188_v37 = vsel %vm1180_vm1, %v1179_v34, %v1171_v47  ;;  %1092 = vmatpush1.msra.mxu0 %v1048_v27  ;;  %977 = vmatprep.mubr.f32.mxu1 %v3753_v0  ;;  %v1359_v27 = vrot.slane %v2419_v5, %v3162_v25 }
 0x1d1   : > { %v1208_v39 = vmul.f32 %v3268_v31, %v1188_v37  ;;  %v1209_v40 = vmul.f32 %v1199_v32, %v1184_v36  ;;  %v1167_v54 = vpop.permute.xlu0 %1166  ;;  %1093 = vmatprep.subr.mxu0 %v1047_v63  ;;  %v1202_v34 = vmul.f32 %v3268_v31, %v3113_v9  ;;  %v1211_v36 = vld [vmem:[#allocation2 + $0x60] sm:$0xff]  ;;  %v1507_v9 = vsel %vm1500_vm3, %v3129_v14, %v3126_v13  ;;  %v1053_v13 = vld [vmem:[#allocation2 + $0x50] sm:$0xff]  ;;  %v1212_v14 = vld [vmem:[#allocation2 + $0x68] sm:$0xff] }
 0x1d2   : > { %1094 = vmatpush1.msra.mxu0 %v1046_v61  ;;  %v2424_v61 = vld [vmem:[%s3741_s5 + $0x6] ss:$8 sm:$0x3] }
 0x1d3   : > { %v1015_v2 = vpop.permute.xlu1 %1014  ;;  %2406 = vmatmul.mubr.msk.f32.gmra.mxu1 %vm476_vm0, %v892_v38  ;;  %1251 = vmatprep.subr.mxu1 %v1209_v40  ;;  %v3338_v38 = vrot.slane %v2424_v61, %v3160_v24 }
 0x1d4   : > { %v1022_v43 = vsel %vm1020_vm7, %v1007_v30, %v1015_v2  ;;  %v1026_v44 = vsel %vm1020_vm7, %v1015_v2, %v1007_v30  ;;  %1252 = vmatpush1.msra.mxu1 %v1208_v39  ;;  %983 = vmatprep.mubr.f32.mxu1 %v3753_v0  ;;  %v1347_v30 = vsel %vm1340_vm2, %v3118_v11, %v3115_v10 }
 0x1d5   : > { %v1044_v46 = vmul.f32 %v1035_v48, %v1026_v44  ;;  %v1045_v47 = vmul.f32 %v1039_v57, %v1022_v43  ;;  %1253 = vmatprep.subr.mxu1 %v1207_v41  ;;  %v1331_v59 = vpop.permute.xlu0 %1330  ;;  %v894_v57 = vld [vmem:[#allocation2 + $0x38] sm:$0xff]  ;;  %v1367_v37 = vmul.f32 %v1359_v27, %v1347_v30  ;;  %v1519_v39 = vrot.slane %v2424_v61, %v3162_v25 }
 0x1d6   : > { %1254 = vmatpush1.msra.mxu1 %v1206_v55  ;;  %v1366_v55 = vmul.f32 %v3316_v8, %v3124_v12  ;;  %v1345_v12 = vsel %vm1340_vm2, %v3139_v17, %v3137_v16  ;;  %v1054_v16 = vld [vmem:[#allocation2 + $0x58] sm:$0xff]  ;;  %v1213_v17 = vld [vmem:[#allocation2 + $0x70] sm:$0xff]  ;;  %v1522_v61 = vmul.f32 %v3338_v38, %v3155_v22 }
 0x1d7   : > { %v1175_v58 = vpop.permute.xlu1 %1174  ;;  %2407 = vmatmul.mubr.msk.f32.gmra.mxu1 %vm476_vm0, %v893_v45  ;;  %1095 = vmatprep.subr.mxu0 %v1045_v47  ;;  %v1527_v42 = vmul.f32 %v1519_v39, %v1507_v9  ;;  %v1373_v9 = vld [vmem:[#allocation2 + $0xb0] sm:$0xff] }
 0x1d8   : > { %v1182_v60 = vsel %vm1180_vm1, %v1167_v54, %v1175_v58  ;;  %v1186_v48 = vsel %vm1180_vm1, %v1175_v58, %v1167_v54  ;;  %1096 = vmatpush1.msra.mxu0 %v1044_v46  ;;  %989 = vmatprep.mubr.f32.mxu1 %v3753_v0  ;;  %v1526_v46 = vmul.f32 %v3338_v38, %v3135_v15 }
 0x1d9   : > { %v1204_v53 = vmul.f32 %v3268_v31, %v1186_v48  ;;  %v1205_v4 = vmul.f32 %v1199_v32, %v1182_v60  ;;  %v1491_v20 = vpop.permute.xlu0 %1490  ;;  %1097 = vmatprep.subr.mxu0 %v1043_v56  ;;  %v1363_v56 = vmul.f32 %v1359_v27, %v1345_v12  ;;  %v1505_v15 = vsel %vm1500_vm3, %v3149_v21, %v3147_v19 }
 0x1da   : > { %1098 = vmatpush1.msra.mxu0 %v1042_v50  ;;  %v1362_v48 = vmul.f32 %v3316_v8, %v3145_v18  ;;  %v2434_v18 = vld [vmem:[%s3741_s5 + $0x10] ss:$8 sm:$0x3] }
 0x1db   : > { %v1339_v29 = vpop.permute.xlu1 %1338  ;;  %2408 = vmatmul.mubr.msk.f32.gmra.mxu1 %vm476_vm0, %v894_v57  ;;  %2410 = vmatmul.mubr.msk.f32.vlgmr.msra.gmra.mxu0 %vm476_vm0, %v1051_v52  ;;  %v1214_v52 = vld [vmem:[#allocation2 + $0x78] sm:$0xff] }
 0x1dc   : > { %v1344_v32 = vsel %vm1340_vm2, %v1331_v59, %v1339_v29  ;;  %v1348_v63 = vsel %vm1340_vm2, %v1339_v29, %v1331_v59  ;;  %1255 = vmatprep.subr.mxu1 %v1205_v4  ;;  %1137 = vmatprep.mubr.f32.mxu0 %v3753_v0  ;;  %v1523_v4 = vmul.f32 %v1519_v39, %v1505_v15 }
 0x1dd   : > { %v1368_v35 = vmul.f32 %v3316_v8, %v1344_v32  ;;  %v1369_v10 = vmul.f32 %v1359_v27, %v1348_v63  ;;  %1256 = vmatpush1.msra.mxu1 %v1204_v53  ;;  %v1327_v11 = vpop.permute.xlu0 %1326  ;;  %1291 = vmatprep.mubr.f32.mxu1 %v3753_v0  ;;  %v1371_v53 = vld [vmem:[#allocation2 + $0xa0] sm:$0xff] }
 0x1de   : > { %1257 = vmatprep.subr.mxu1 %v1203_v7  ;;  %v3393_v7 = vrot.slane %v2429_v3, %v3162_v25 }
 0x1df   : > { %1258 = vmatpush1.msra.mxu1 %v1202_v34  ;;  %v1499_v40 = vpop.permute.xlu1 %1498  ;;  %2411 = vmatmul.mubr.msk.f32.gmra.mxu0 %vm476_vm0, %v1052_v33  ;;  %v1531_v33 = vld [vmem:[#allocation2 + $0xc0] sm:$0xff]  ;;  %v3415_v34 = vrot.slane %v2434_v18, %v3160_v24 }
 0x1e0   : > { %v1504_v31 = vsel %vm1500_vm3, %v1491_v20, %v1499_v40  ;;  %v1508_v54 = vsel %vm1500_vm3, %v1499_v40, %v1491_v20  ;;  %2415 = vmatmul.mubr.msk.f32.vlgmr.msra.gmra.mxu1 %vm476_vm0, %v1211_v36  ;;  %1411 = vmatprep.subr.mxu0 %v1369_v10  ;;  %v3390_v20 = vrot.slane %v2429_v3, %v3160_v24 }
 0x1e1   : > { %v1528_v41 = vmul.f32 %v3338_v38, %v1504_v31  ;;  %v1529_v1 = vmul.f32 %v1519_v39, %v1508_v54  ;;  %1412 = vmatpush1.msra.mxu0 %v1368_v35  ;;  %v1487_v2 = vpop.permute.xlu0 %1486  ;;  %1143 = vmatprep.mubr.f32.mxu0 %v3753_v0  ;;  %v3422_v10 = vrot.slane %v2434_v18, %v3162_v25  ;;  %v1532_v31 = vld [vmem:[#allocation2 + $0xc8] sm:$0xff] }
 0x1e2   : > { %1413 = vmatprep.subr.mxu0 %v1367_v37  ;;  %1297 = vmatprep.mubr.f32.mxu1 %v3753_v0  ;;  %v1686_v22 = vmul.f32 %v3390_v20, %v3173_v28  ;;  %v1823_v36 = vsel %vm1820_vm8, %v3202_v49, %v3204_v51  ;;  %v1827_v25 = vsel %vm1820_vm8, %v3204_v51, %v3202_v49 }
 0x1e3   : > { %1414 = vmatpush1.msra.mxu0 %v1366_v55  ;;  %v1335_v43 = vpop.permute.xlu1 %1334  ;;  %1571 = vmatprep.subr.mxu1 %v1529_v1  ;;  %v1846_v54 = vmul.f32 %v3415_v34, %v1823_v36  ;;  %v1847_v49 = vmul.f32 %v3422_v10, %v1827_v25 }
 0x1e4   : > { %v1342_v44 = vsel %vm1340_vm2, %v1327_v11, %v1335_v43  ;;  %v1346_v45 = vsel %vm1340_vm2, %v1335_v43, %v1327_v11  ;;  %2412 = vmatmul.mubr.msk.f32.gmra.mxu0 %vm476_vm0, %v1053_v13  ;;  %2416 = vmatmul.mubr.msk.f32.gmra.mxu1 %vm476_vm0, %v1212_v14  ;;  %v1533_v43 = vld [vmem:[#allocation2 + $0xd0] sm:$0xff] }
 0x1e5   : > { %v1364_v47 = vmul.f32 %v3316_v8, %v1342_v44  ;;  %v1365_v59 = vmul.f32 %v1359_v27, %v1346_v45  ;;  %1572 = vmatpush1.msra.mxu1 %v1528_v41  ;;  %v1651_v50 = vpop.permute.xlu0 %1650  ;;  %1149 = vmatprep.mubr.f32.mxu0 %v3753_v0  ;;  %v1667_v27 = vsel %vm1660_vm4, %v3164_v26, %v3157_v23  ;;  %v1372_v26 = vld [vmem:[#allocation2 + $0xa8] sm:$0xff] }
 0x1e6   : > { %1573 = vmatprep.subr.mxu1 %v1527_v42  ;;  %1303 = vmatprep.mubr.f32.mxu1 %v3753_v0  ;;  %v1687_v35 = vmul.f32 %v3393_v7, %v1667_v27  ;;  %v1374_v42 = vld [vmem:[#allocation2 + $0xb8] sm:$0xff] }
 0x1e7   : > { %1574 = vmatpush1.msra.mxu1 %v1526_v46  ;;  %v1495_v58 = vpop.permute.xlu1 %1494  ;;  %1415 = vmatprep.subr.mxu0 %v1365_v59 }
 0x1e8   : > { %v1502_v5 = vsel %vm1500_vm3, %v1487_v2, %v1495_v58  ;;  %v1506_v60 = vsel %vm1500_vm3, %v1495_v58, %v1487_v2  ;;  %2413 = vmatmul.mubr.msk.f32.gmra.mxu0 %vm476_vm0, %v1054_v16  ;;  %2417 = vmatmul.mubr.msk.f32.gmra.mxu1 %vm476_vm0, %v1213_v17  ;;  %v1534_v16 = vld [vmem:[#allocation2 + $0xd8] sm:$0xff]  ;;  %v1691_v17 = vld [vmem:[#allocation2 + $0xe0] sm:$0xff] }
 0x1e9   : > { %v1524_v57 = vmul.f32 %v3338_v38, %v1502_v5  ;;  %v1525_v19 = vmul.f32 %v1519_v39, %v1506_v60  ;;  %1416 = vmatpush1.msra.mxu0 %v1364_v47  ;;  %v1811_v21 = vpop.permute.xlu0 %1810  ;;  %1309 = vmatprep.mubr.f32.mxu1 %v3753_v0 }
 0x1ea   : > { %1417 = vmatprep.subr.mxu0 %v1363_v56  ;;  %1451 = vmatprep.mubr.f32.mxu0 %v3753_v0 }
 0x1eb   : > { %1418 = vmatpush1.msra.mxu0 %v1362_v48  ;;  %v1659_v8 = vpop.permute.xlu1 %1658  ;;  %1575 = vmatprep.subr.mxu1 %v1525_v19  ;;  %v1692_v48 = vld [vmem:[#allocation2 + $0xe8] sm:$0xff] }
 0x1ec   : > { %v1664_v29 = vsel %vm1660_vm4, %v1651_v50, %v1659_v8  ;;  %v1668_v30 = vsel %vm1660_vm4, %v1659_v8, %v1651_v50  ;;  %2418 = vmatmul.mubr.msk.f32.gmra.mxu1 %vm476_vm0, %v1214_v52  ;;  %2420 = vmatmul.mubr.msk.f32.vlgmr.msra.gmra.mxu0 %vm476_vm0, %v1371_v53  ;;  %v1852_v19 = vld [vmem:[#allocation2 + $0x108] sm:$0xff]  ;;  %v1853_v52 = vld [vmem:[#allocation2 + $0x110] sm:$0xff]  ;;  %v1854_v53 = vld [vmem:[#allocation2 + $0x118] sm:$0xff] }
 0x1ed   : > { %v1688_v32 = vmul.f32 %v3390_v20, %v1664_v29  ;;  %v1689_v63 = vmul.f32 %v3393_v7, %v1668_v30  ;;  %1576 = vmatpush1.msra.mxu1 %v1524_v57  ;;  %v1647_v23 = vpop.permute.xlu0 %1646  ;;  %1457 = vmatprep.mubr.f32.mxu0 %v3753_v0  ;;  %v1851_v57 = vld [vmem:[#allocation2 + $0x100] sm:$0xff] }
 0x1ee   : > { %1577 = vmatprep.subr.mxu1 %v1523_v4  ;;  %1611 = vmatprep.mubr.f32.mxu1 %v3753_v0  ;;  %v821_v4 = vpop.f32.mrf.mxu0 }
 0x1ef   : > { %1578 = vmatpush1.msra.mxu1 %v1522_v61  ;;  %v1819_v11 = vpop.permute.xlu1 %1818  ;;  %1731 = vmatprep.subr.mxu0 %v1689_v63 }
 0x1f0   : > { %v1824_v37 = vsel %vm1820_vm8, %v1811_v21, %v1819_v11  ;;  %v1828_v38 = vsel %vm1820_vm8, %v1819_v11, %v1811_v21  ;;  %2421 = vmatmul.mubr.msk.f32.gmra.mxu0 %vm476_vm0, %v1372_v26  ;;  %2425 = vmatmul.mubr.msk.f32.vlgmr.msra.gmra.mxu1 %vm476_vm0, %v1531_v33  ;;  %v1694_v21 = vld [vmem:[#allocation2 + $0xf8] sm:$0xff]  ;;  %v823_v18 = vpop.f32.mrf.mxu0 }
 0x1f1   : > { %v1848_v28 = vmul.f32 %v3415_v34, %v1824_v37  ;;  %v1849_v39 = vmul.f32 %v3422_v10, %v1828_v38  ;;  %1732 = vmatpush1.msra.mxu0 %v1688_v32  ;;  %v1645_v40 = vpop.permute.xlu0 %1644  ;;  %1463 = vmatprep.mubr.f32.mxu0 %v3753_v0 }
 0x1f2   : > { %1733 = vmatprep.subr.mxu0 %v1687_v35  ;;  %1617 = vmatprep.mubr.f32.mxu1 %v3753_v0  ;;  %v1665_v1 = vsel %vm1660_vm4, %v3206_v62, %v1645_v40  ;;  %v1661_v12 = vsel %vm1660_vm4, %v1645_v40, %v3206_v62  ;;  %v827_v27 = vpop.f32.mrf.mxu0 }
 0x1f3   : > { %1734 = vmatpush1.msra.mxu0 %v1686_v22  ;;  %v1655_v55 = vpop.permute.xlu1 %1654  ;;  %1891 = vmatprep.subr.mxu1 %v1849_v39  ;;  %v1683_v45 = vmul.f32 %v3393_v7, %v1665_v1  ;;  %v1682_v62 = vmul.f32 %v3390_v20, %v1661_v12 }
 0x1f4   : > { %v1662_v51 = vsel %vm1660_vm4, %v1647_v23, %v1655_v55  ;;  %v1666_v41 = vsel %vm1660_vm4, %v1655_v55, %v1647_v23  ;;  %2422 = vmatmul.mubr.msk.f32.gmra.mxu0 %vm476_vm0, %v1373_v9  ;;  %2426 = vmatmul.mubr.msk.f32.gmra.mxu1 %vm476_vm0, %v1532_v31  ;;  %v829_v61 = vpop.f32.mrf.mxu0 }
 0x1f5   : > { %v1684_v2 = vmul.f32 %v3390_v20, %v1662_v51  ;;  %v1685_v13 = vmul.f32 %v3393_v7, %v1666_v41  ;;  %1892 = vmatpush1.msra.mxu1 %v1848_v28  ;;  %v1807_v14 = vpop.permute.xlu0 %1806  ;;  %1469 = vmatprep.mubr.f32.mxu0 %v3753_v0 }
 0x1f6   : > { %1893 = vmatprep.subr.mxu1 %v1847_v49  ;;  %1623 = vmatprep.mubr.f32.mxu1 %v3753_v0  ;;  %v833_v23 = vpop.f32.mrf.mxu0 }
 0x1f7   : > { %1894 = vmatpush1.msra.mxu1 %v1846_v54  ;;  %v1815_v44 = vpop.permute.xlu1 %1814  ;;  %1735 = vmatprep.subr.mxu0 %v1685_v13 }
 0x1f8   : > { %v1822_v46 = vsel %vm1820_vm8, %v1807_v14, %v1815_v44  ;;  %v1826_v47 = vsel %vm1820_vm8, %v1815_v44, %v1807_v14  ;;  %2423 = vmatmul.mubr.msk.f32.gmra.mxu0 %vm476_vm0, %v1374_v42  ;;  %2427 = vmatmul.mubr.msk.f32.gmra.mxu1 %vm476_vm0, %v1533_v43 }
 0x1f9   : > { %v1844_v59 = vmul.f32 %v3415_v34, %v1822_v46  ;;  %v1845_v50 = vmul.f32 %v3422_v10, %v1826_v47  ;;  %1736 = vmatpush1.msra.mxu0 %v1684_v2  ;;  %1629 = vmatprep.mubr.f32.mxu1 %v3753_v0  ;;  %v1805_v56 = vpop.permute.xlu0 %1804 }
 0x1fa   : > { %1737 = vmatprep.subr.mxu0 %v1683_v45  ;;  %1771 = vmatprep.mubr.f32.mxu0 %v3753_v0 }
 0x1fb   : > { %1738 = vmatpush1.msra.mxu0 %v1682_v62  ;;  %v1813_v58 = vpop.permute.xlu1 %1812  ;;  %1895 = vmatprep.subr.mxu1 %v1845_v50 }
 0x1fc   : > { %v1821_v15 = vsel %vm1820_vm8, %v1805_v56, %v1813_v58  ;;  %v1825_v3 = vsel %vm1820_vm8, %v1813_v58, %v1805_v56  ;;  %2428 = vmatmul.mubr.msk.f32.gmra.mxu1 %vm476_vm0, %v1534_v16  ;;  %2430 = vmatmul.mubr.msk.f32.vlgmr.msra.gmra.mxu0 %vm476_vm0, %v1691_v17 }
 0x1fd   : > { %v1842_v5 = vmul.f32 %v3415_v34, %v1821_v15  ;;  %v1843_v60 = vmul.f32 %v3422_v10, %v1825_v3  ;;  %1896 = vmatpush1.msra.mxu1 %v1844_v59  ;;  %1777 = vmatprep.mubr.f32.mxu0 %v3753_v0  ;;  %v835_v34 = vpop.f32.mrf.mxu0 }
 0x1fe   : > { %1931 = vmatprep.mubr.f32.mxu1 %v3753_v0 }
 0x1ff   : > { %1897 = vmatprep.subr.mxu1 %v1843_v60  ;;  %v839_v10 = vpop.f32.mrf.mxu0 }
 0x200   : > { %2431 = vmatmul.mubr.msk.f32.gmra.mxu0 %vm476_vm0, %v1692_v48  ;;  %1898 = vmatpush1.msra.mxu1 %v1842_v5 }
 0x201   : > { %2435 = vmatmul.mubr.msk.f32.vlgmr.msra.gmra.mxu1 %vm476_vm0, %v1851_v57  ;;  %1783 = vmatprep.mubr.f32.mxu0 %v3753_v0  ;;  %v3499_v37 = vpop.f32.mrf.mxu0 }
 0x202   : > { %1937 = vmatprep.mubr.f32.mxu1 %v3753_v0 }
 0x204   : > { %2432 = vmatmul.mubr.msk.f32.gmra.mxu0 %vm476_vm0, %v1693_v6 }
 0x205   : > { %2436 = vmatmul.mubr.msk.f32.gmra.mxu1 %vm476_vm0, %v1852_v19  ;;  %1789 = vmatprep.mubr.f32.mxu0 %v3753_v0 }
 0x206   : > { %1943 = vmatprep.mubr.f32.mxu1 %v3753_v0 }
 0x208   : > { %2433 = vmatmul.mubr.msk.f32.gmra.mxu0 %vm476_vm0, %v1694_v21 }
 0x209   : > { %2437 = vmatmul.mubr.msk.f32.gmra.mxu1 %vm476_vm0, %v1853_v52  ;;  %2234 = vmatprep.mubr.f32.mxu0 %v3753_v0 }
 0x20a   : > { %1949 = vmatprep.mubr.f32.mxu1 %v3753_v0 }
 0x20d   : > { %2438 = vmatmul.mubr.msk.f32.gmra.mxu1 %vm476_vm0, %v1854_v53 }
 0x27f   : > { %v720_v20 = vpop.f32.mrf.mxu1 }
 0x280   : > { %v822_v50 = vadd.f32 %v821_v4, %v720_v20 }
 0x281   : > { %v722_v7 = vpop.f32.mrf.mxu1 }
 0x282   : > { %v824_v56 = vadd.f32 %v823_v18, %v722_v7 }
 0x283   : > { %v726_v8 = vpop.f32.mrf.mxu1 }
 0x284   : > { %v828_v5 = vadd.f32 %v827_v27, %v726_v8 }
 0x285   : > { %v728_v29 = vpop.f32.mrf.mxu1 }
 0x286   : > { %v830_v19 = vadd.f32 %v829_v61, %v728_v29 }
 0x287   : > { %v732_v30 = vpop.f32.mrf.mxu1 }
 0x288   : > { %v834_v4 = vadd.f32 %v833_v23, %v732_v30 }
 0x289   : > { %v734_v32 = vpop.f32.mrf.mxu1 }
 0x28a   : > { %v836_v8 = vadd.f32 %v835_v34, %v734_v32 }
 0x28b   : > { %v3495_v63 = vpop.f32.mrf.mxu1 }
 0x28c   : > { %v840_v61 = vadd.f32 %v839_v10, %v3495_v63 }
 0x28d   : > { %v3497_v26 = vpop.f32.mrf.mxu1 }
 0x28f   : > { %v973_v33 = vpop.f32.mrf.mxu1 }
 0x290   : > { %v996_v58 = vadd.f32 %v973_v33, %v822_v50 }
 0x291   : > { %v975_v22 = vpop.f32.mrf.mxu1 }
 0x292   : > { %v997_v60 = vadd.f32 %v975_v22, %v824_v56 }
 0x293   : > { %v979_v35 = vpop.f32.mrf.mxu1 }
 0x294   : > { %v998_v21 = vadd.f32 %v979_v35, %v828_v5 }
 0x295   : > { %v981_v11 = vpop.f32.mrf.mxu1 }
 0x296   : > { %v999_v20 = vadd.f32 %v981_v11, %v830_v19 }
 0x297   : > { %v985_v36 = vpop.f32.mrf.mxu1 }
 0x298   : > { %v1000_v27 = vadd.f32 %v985_v36, %v834_v4 }
 0x299   : > { %v987_v38 = vpop.f32.mrf.mxu1 }
 0x29a   : > { %v1001_v35 = vadd.f32 %v987_v38, %v836_v8  ;;  %v1971_v38 = vpop.permute.xlu0 %1970 }
 0x29b   : > { %v3501_v25 = vpop.f32.mrf.mxu1  ;;  %v1133_v28 = vpop.f32.mrf.mxu0 }
 0x29c   : > { %v1156_v48 = vadd.f32 %v1133_v28, %v996_v58  ;;  %v1002_v32 = vadd.f32 %v3501_v25, %v840_v61 }
 0x29d   : > { %v3503_v39 = vpop.f32.mrf.mxu1  ;;  %v1135_v40 = vpop.f32.mrf.mxu0 }
 0x29e   : > { %v1157_v52 = vadd.f32 %v1135_v40, %v997_v60 }
 0x29f   : > { %v1139_v9 = vpop.f32.mrf.mxu0 }
 0x2a0   : > { %v1293_v31 = vpop.f32.mrf.mxu1 }
 0x2a1   : > { %v1141_v54 = vpop.f32.mrf.mxu0  ;;  %v1316_v53 = vadd.f32 %v1293_v31, %v1156_v48 }
 0x2a2   : > { %v1295_v55 = vpop.f32.mrf.mxu1  ;;  %v1159_v22 = vadd.f32 %v1141_v54, %v999_v20 }
 0x2a3   : > { %v1317_v7 = vadd.f32 %v1295_v55, %v1157_v52  ;;  %v842_v55 = vadd.f32 %v3499_v37, %v3497_v26 }
 0x2a4   : > { %v1145_v49 = vpop.f32.mrf.mxu0  ;;  %v1299_v51 = vpop.f32.mrf.mxu1 }
 0x2a5   : > { %v1160_v40 = vadd.f32 %v1145_v49, %v1000_v27  ;;  %v1003_v49 = vadd.f32 %v3503_v39, %v842_v55  ;;  %v1981_v27 = vpop.permute.xlu0 %1980 }
 0x2a6   : > { %v1147_v41 = vpop.f32.mrf.mxu0  ;;  %v1301_v1 = vpop.f32.mrf.mxu1 }
 0x2a7   : > { %v1319_v5 = vadd.f32 %v1301_v1, %v1159_v22  ;;  %v1161_v34 = vadd.f32 %v1147_v41, %v1001_v35 }
 0x2a8   : > { %v3505_v2 = vpop.f32.mrf.mxu0  ;;  %v1305_v13 = vpop.f32.mrf.mxu1 }
 0x2a9   : > { %v1320_v36 = vadd.f32 %v1305_v13, %v1160_v40  ;;  %v1162_v1 = vadd.f32 %v3505_v2, %v1002_v32 }
 0x2aa   : > { %v3507_v14 = vpop.f32.mrf.mxu0  ;;  %v3509_v42 = vpop.f32.mrf.mxu1 }
 0x2ac   : > { %v3511_v43 = vpop.f32.mrf.mxu1  ;;  %v1453_v12 = vpop.f32.mrf.mxu0 }
 0x2ad   : > { %v1476_v18 = vadd.f32 %v1453_v12, %v1316_v53 }
 0x2ae   : > { %v3513_v44 = vpop.f32.mrf.mxu1  ;;  %v1455_v45 = vpop.f32.mrf.mxu0 }
 0x2af   : > { %3768 = vst [vmem:[#allocation15_spill] sm:$0xff] %v3513_v44  ;;  %v1158_v44 = vadd.f32 %v1139_v9, %v998_v21  ;;  %v1477_v56 = vadd.f32 %v1455_v45, %v1317_v7  ;;  %v1321_v45 = vadd.f32 %v3509_v42, %v1161_v34 }
 0x2b0   : > { %v1459_v46 = vpop.f32.mrf.mxu0  ;;  %v1613_v47 = vpop.f32.mrf.mxu1 }
 0x2b1   : > { %v1318_v28 = vadd.f32 %v1299_v51, %v1158_v44  ;;  %v1636_v58 = vadd.f32 %v1613_v47, %v1476_v18 }
 0x2b2   : > { %v1461_v62 = vpop.f32.mrf.mxu0  ;;  %v1615_v59 = vpop.f32.mrf.mxu1 }
 0x2b3   : > { %v1478_v30 = vadd.f32 %v1459_v46, %v1318_v28  ;;  %v1637_v23 = vadd.f32 %v1615_v59, %v1477_v56  ;;  %v1479_v51 = vadd.f32 %v1461_v62, %v1319_v5  ;;  %v1163_v62 = vadd.f32 %v3507_v14, %v1003_v49  ;;  %v2022_v49 = vld [vmem:[%s3742_s6 + $0x8] sm:$0xff] }
 0x2b4   : > { %v1465_v16 = vpop.f32.mrf.mxu0  ;;  %v1619_v17 = vpop.f32.mrf.mxu1  ;;  %v1322_v59 = vadd.f32 %v3511_v43, %v1162_v1 }
 0x2b5   : > { %v1638_v12 = vadd.f32 %v1619_v17, %v1478_v30  ;;  %v1480_v46 = vadd.f32 %v1465_v16, %v1320_v36  ;;  %v1976_v16 = vpop.permute.xlu1 %1975 }
 0x2b6   : > { %v1467_v15 = vpop.f32.mrf.mxu0  ;;  %v1621_v3 = vpop.f32.mrf.mxu1  ;;  %v3769_v21 = vld [vmem:[#allocation15_spill] sm:$0xff] }
 0x2b7   : > { %v1639_v26 = vadd.f32 %v1621_v3, %v1479_v51  ;;  %v1481_v17 = vadd.f32 %v1467_v15, %v1321_v45  ;;  %v1323_v3 = vadd.f32 %v3769_v21, %v1163_v62 }
 0x2b8   : > { %v3515_v57 = vpop.f32.mrf.mxu0  ;;  %v1625_v6 = vpop.f32.mrf.mxu1 }
 0x2b9   : > { %v1640_v60 = vadd.f32 %v1625_v6, %v1480_v46  ;;  %v1482_v52 = vadd.f32 %v3515_v57, %v1322_v59 }
 0x2ba   : > { %v3517_v0 = vpop.f32.mrf.mxu0  ;;  %v1627_v24 = vpop.f32.mrf.mxu1 }
 0x2bb   : > { %v1641_v53 = vadd.f32 %v1627_v24, %v1481_v17  ;;  %v1483_v18 = vadd.f32 %v3517_v0, %v1323_v3 }
 0x2bc   : > { %v1631_v33 = vpop.f32.mrf.mxu1  ;;  %v1773_v50 = vpop.f32.mrf.mxu0 }
 0x2bd   : > { %v1796_v11 = vadd.f32 %v1773_v50, %v1636_v58  ;;  %v1642_v50 = vadd.f32 %v1631_v33, %v1482_v52 }
 0x2be   : > { %v1775_v29 = vpop.f32.mrf.mxu0  ;;  %v1633_v31 = vpop.f32.mrf.mxu1 }
 0x2bf   : > { %v1797_v44 = vadd.f32 %v1775_v29, %v1637_v23  ;;  %v1643_v56 = vadd.f32 %v1633_v31, %v1483_v18 }
 0x2c0   : > { %v1779_v9 = vpop.f32.mrf.mxu0 }
 0x2c1   : > { %v1933_v54 = vpop.f32.mrf.mxu1  ;;  %v1798_v37 = vadd.f32 %v1779_v9, %v1638_v12  ;;  %v1986_v9 = vpop.permute.xlu1 %1985 }
 0x2c2   : > { %v1781_v63 = vpop.f32.mrf.mxu0  ;;  %v1956_v10 = vadd.f32 %v1933_v54, %v1796_v11 }
 0x2c3   : > { %v1935_v47 = vpop.f32.mrf.mxu1  ;;  %v1799_v39 = vadd.f32 %v1781_v63, %v1639_v26 }
 0x2c4   : > { %v3526_v25 = vadd.f32 %v1971_v38, %v1956_v10  ;;  %v1785_v41 = vpop.f32.mrf.mxu0  ;;  %v1957_v13 = vadd.f32 %v1935_v47, %v1797_v44  ;;  %v2021_v47 = vld [vmem:[%s3742_s6] sm:$0xff] }
 0x2c5   : > { %v1939_v48 = vpop.f32.mrf.mxu1  ;;  %v1800_v4 = vadd.f32 %v1785_v41, %v1640_v60  ;;  %v2024_v60 = vld [vmem:[%s3742_s6 + $0x18] sm:$0xff] }
 0x2c6   : > { %v3530_v19 = vadd.f32 %v1971_v38, %v1957_v13  ;;  %v1787_v2 = vpop.f32.mrf.mxu0  ;;  %v1958_v42 = vadd.f32 %v1939_v48, %v1798_v37  ;;  %v1996_v14 = vmax.f32 %v3526_v25, 0.0  ;;  %v2023_v37 = vld [vmem:[%s3742_s6 + $0x10] sm:$0xff]  ;;  %v2131_v25 = vld [vmem:[%s3746_s10 + $0x8] sm:$0xff] }
 0x2c7   : > { %v1941_v20 = vpop.f32.mrf.mxu1  ;;  %v1801_v22 = vadd.f32 %v1787_v2, %v1641_v53 }
 0x2c8   : > { %v1997_v43 = vmax.f32 %v3530_v19, 0.0  ;;  %v3536_v15 = vadd.f32 %v1976_v16, %v1958_v42  ;;  %v1791_v6 = vpop.f32.mrf.mxu0  ;;  %v1959_v7 = vadd.f32 %v1941_v20, %v1799_v39  ;;  %v2132_v19 = vld [vmem:[%s3746_s10 + $0x10] sm:$0xff] }
 0x2c9   : > { %v1945_v8 = vpop.f32.mrf.mxu1  ;;  %v1802_v58 = vadd.f32 %v1791_v6, %v1642_v50  ;;  %v2043_v50 = vld [vmem:[#allocation5] sm:$0x1] }
 0x2ca   : > { %v3539_v28 = vadd.f32 %v1976_v16, %v1959_v7  ;;  %v1960_v57 = vadd.f32 %v1945_v8, %v1800_v4  ;;  %v2004_v24 = vadd.f32 %v1997_v43, %v1996_v14  ;;  %v1793_v29 = vpop.f32.mrf.mxu0  ;;  %v1998_v35 = vmax.f32 %v3536_v15, 0.0  ;;  %v2130_v15 = vld [vmem:[%s3746_s10] sm:$0xff] }
 0x2cb   : > { %v1947_v61 = vpop.f32.mrf.mxu1  ;;  %v1803_v30 = vadd.f32 %v1793_v29, %v1643_v56  ;;  %v3770_v56 = vld [vmem:[#allocation14_spill] sm:$0xff] }
 0x2cc   : > { %v1999_v0 = vmax.f32 %v3539_v28, 0.0  ;;  %v3547_v33 = vadd.f32 %v1981_v27, %v1960_v57  ;;  %v1961_v40 = vadd.f32 %v1947_v61, %v1801_v22  ;;  %2005 = vadd.xlane.f32.xlu0 %v2004_v24  ;;  %v2049_v57 = vld [vmem:[%s3744_s8 + $0x18] sm:$0xff]  ;;  %v2048_v24 = vld [vmem:[%s3744_s8 + $0x10] sm:$0xff]  ;;  %v2047_v29 = vld [vmem:[%s3744_s8 + $0x8] sm:$0xff]  ;;  %v3771_v28 = vmov 0.0  }
 0x2cd   : > { %v1951_v5 = vpop.f32.mrf.mxu1  ;;  %v2046_v61 = vld [vmem:[%s3744_s8] sm:$0xff] }
 0x2ce   : > { %v3549_v23 = vadd.f32 %v1981_v27, %v1961_v40  ;;  %v1962_v11 = vadd.f32 %v1951_v5, %v1802_v58  ;;  %v2007_v31 = vadd.f32 %v1999_v0, %v1998_v35  ;;  %v2000_v32 = vmax.f32 %v3547_v33, 0.0 }
 0x2cf   : > { %v1953_v55 = vpop.f32.mrf.mxu1 }
 0x2d0   : > { %v2001_v34 = vmax.f32 %v3549_v23, 0.0  ;;  %v3557_v36 = vadd.f32 %v1986_v9, %v1962_v11  ;;  %v1963_v54 = vadd.f32 %v1953_v55, %v1803_v30  ;;  %2008 = vadd.xlane.f32.xlu1 %v2007_v31 }
 0x2d2   : > { %v3559_v51 = vadd.f32 %v1986_v9, %v1963_v54  ;;  %v2010_v12 = vadd.f32 %v2001_v34, %v2000_v32  ;;  %v2002_v44 = vmax.f32 %v3557_v36, 0.0 }
 0x2d4   : > { %v2003_v63 = vmax.f32 %v3559_v51, 0.0  ;;  %2011 = vadd.xlane.f32.xlu0 %v2010_v12  ;;  %v2073_v12 = vld [vmem:[%s3745_s9 + $0x18] sm:$0xff] }
 0x2d6   : > { %v2013_v10 = vadd.f32 %v2003_v63, %v2002_v44 }
 0x2d8   : > { %2014 = vadd.xlane.f32.xlu0 %v2013_v10  ;;  %v2072_v10 = vld [vmem:[%s3745_s9 + $0x10] sm:$0xff] }
 0x355   : > { %v2006_v38 = vpop.xlane.xlu0 %2005 }
 0x356   : > { %v2017_v45 = vmul.f32 0.00390625, %v2006_v38 }
 0x358   : > { %v2025_v13 = vmul.f32 %v2021_v47, %v2017_v45  ;;  %v2070_v47 = vld [vmem:[%s3745_s9] sm:$0xff] }
 0x359   : > { %v2009_v1 = vpop.xlane.xlu1 %2008 }
 0x35a   : > { %v2018_v46 = vmul.f32 0.00390625, %v2009_v1  ;;  %v2030_v39 = vsel %vm2029_vm9, %v2025_v13, 0.0 }
 0x35c   : > { %v2026_v26 = vmul.f32 %v2022_v49, %v2018_v46  ;;  %v2071_v46 = vld [vmem:[%s3745_s9 + $0x8] sm:$0xff] }
 0x35d   : > { %v2012_v41 = vpop.xlane.xlu0 %2011 }
 0x35e   : > { %v2019_v62 = vmul.f32 0.00390625, %v2012_v41  ;;  %v2031_v59 = vsel %vm2029_vm9, %v2026_v26, 0.0 }
 0x35f   : > { %v2032_v16 = vadd.f32 %v2031_v59, %v2030_v39 }
 0x360   : > { %v2027_v17 = vmul.f32 %v2023_v37, %v2019_v62 }
 0x361   : > { %v2015_v48 = vpop.xlane.xlu0 %2014 }
 0x362   : > { %v2033_v2 = vsel %vm2029_vm9, %v2027_v17, 0.0  ;;  %v2020_v42 = vmul.f32 0.00390625, %v2015_v48 }
 0x363   : > { %v2034_v3 = vadd.f32 %v2033_v2, %v2032_v16 }
 0x364   : > { %v2028_v21 = vmul.f32 %v2024_v60, %v2020_v42 }
 0x366   : > { %v2035_v52 = vsel %vm2029_vm9, %v2028_v21, 0.0 }
 0x367   : > { %v2036_v53 = vadd.f32 %v2035_v52, %v2034_v3 }
 0x369   : > { %v2037_v4 = vrot.slane %v2036_v53, 4 }
 0x36b   : > { %v2038_v20 = vadd.f32 %v2037_v4, %v2036_v53 }
 0x36d   : > { %v2039_v6 = vrot.slane %v2038_v20, 2 }
 0x36f   : > { %v2040_v7 = vadd.f32 %v2039_v6, %v2038_v20  ;;  %v2134_v20 = vld [vmem:[%s3747_s11] sm:$0xff] }
 0x371   : > { %v2041_v18 = vrot.slane %v2040_v7, 1 }
 0x373   : > { %v2042_v8 = vadd.f32 %v2041_v18, %v2040_v7  ;;  %v2136_v7 = vld [vmem:[%s3747_s11 + $0x10] sm:$0xff] }
 0x375   : > { %v2044_v27 = vadd.f32 %v2043_v50, %v2042_v8  ;;  %v2135_v50 = vld [vmem:[%s3747_s11 + $0x8] sm:$0xff]  ;;  %v2137_v8 = vld [vmem:[%s3747_s11 + $0x18] sm:$0xff] }
 0x377   : > { %v2045_v22 = vmax.f32 %v2044_v27, 0.0 }
 0x379   : > { %v2053_v58 = vrot.slane %v2045_v22, %v3770_v56 }
 0x37b   : > { %v2057_v40 = vmul.f32 %v2053_v58, %v2049_v57  ;;  %v2056_v5 = vmul.f32 %v2053_v58, %v2048_v24  ;;  %v2055_v31 = vmul.f32 %v2053_v58, %v2047_v29  ;;  %v2054_v9 = vmul.f32 %v2053_v58, %v2046_v61 }
 0x37d   : > { %v2067_v30 = vsel %vm2029_vm9, %v2057_v40, 0.0  ;;  %v2064_v11 = vsel %vm2029_vm9, %v2056_v5, 0.0  ;;  %v2061_v55 = vsel %vm2029_vm9, %v2055_v31, 0.0  ;;  %v2058_v54 = vsel %vm2029_vm9, %v2054_v9, 0.0 }
 0x37e   : > { %2068 = vadd.xlane.f32.xlu1 %v2067_v30  ;;  %2065 = vadd.xlane.f32.xlu0 %v2064_v11  ;;  %v2554_v11 = vld [vmem:[%s2860_s17 + $0x8] sm:$0xff] }
 0x382   : > { %2062 = vadd.xlane.f32.xlu1 %v2061_v55  ;;  %2059 = vadd.xlane.f32.xlu0 %v2058_v54 }
 0x407   : > { %v2069_v38 = vpop.xlane.xlu1 %2068  ;;  %v2066_v49 = vpop.xlane.xlu0 %2065 }
 0x408   : > { %v2077_v1 = vadd.f32 %v2073_v12, %v2069_v38  ;;  %v2076_v45 = vadd.f32 %v2072_v10, %v2066_v49  ;;  %v2555_v12 = vld [vmem:[%s2860_s17 + $0x10] sm:$0xff] }
 0x40a   : > { %v2442_v26 = vmul.f32 -1.442695, %v2077_v1  ;;  %v2441_v37 = vmul.f32 -1.442695, %v2076_v45 }
 0x40b   : > { %v2063_v41 = vpop.xlane.xlu1 %2062  ;;  %v2060_v13 = vpop.xlane.xlu0 %2059 }
 0x40c   : > { %2537 = vpow2.f32 %v2442_v26  ;;  %v2075_v62 = vadd.f32 %v2071_v46, %v2063_v41  ;;  %v2074_v59 = vadd.f32 %v2070_v47, %v2060_v13  ;;  %v2556_v46 = vld [vmem:[%s2860_s17 + $0x18] sm:$0xff]  ;;  %v2557_v13 = vld [vmem:[%s2860_s17 + $0x20] sm:$0xff] }
 0x40d   : > { %2539 = vpow2.f32 %v2441_v37 }
 0x40e   : > { %v2440_v17 = vmul.f32 -1.442695, %v2075_v62  ;;  %v2439_v60 = vmul.f32 -1.442695, %v2074_v59 }
 0x410   : > { %2541 = vpow2.f32 %v2440_v17 }
 0x411   : > { %2543 = vpow2.f32 %v2439_v60 }
 0x419   : > { %v2538_v48 = vpop.eup %2537 }
 0x41a   : > { %v2540_v39 = vpop.eup %2539  ;;  %v2093_v2 = vadd.f32 1.0, %v2538_v48 }
 0x41b   : > { %v2092_v42 = vadd.f32 1.0, %v2540_v39  ;;  %v2558_v39 = vld [vmem:[%s2860_s17 + $0x28] sm:$0xff] }
 0x41c   : > { %2545 = vrcp.f32 %v2093_v2 }
 0x41d   : > { %v2542_v16 = vpop.eup %2541  ;;  %2547 = vrcp.f32 %v2092_v42 }
 0x41e   : > { %v2544_v21 = vpop.eup %2543  ;;  %v2091_v3 = vadd.f32 1.0, %v2542_v16 }
 0x41f   : > { %v2090_v52 = vadd.f32 1.0, %v2544_v21 }
 0x420   : > { %2549 = vrcp.f32 %v2091_v3  ;;  %v2559_v3 = vld [vmem:[%s2860_s17 + $0x30] sm:$0xff] }
 0x421   : > { %2551 = vrcp.f32 %v2090_v52 }
 0x429   : > { %v2546_v53 = vpop.eup %2545 }
 0x42a   : > { %v2548_v4 = vpop.eup %2547  ;;  %2119 = vperm.xlu1 %2536, %v2546_v53  }
 0x42b   : > { %2114 = vperm.xlu0 %2535, %v2548_v4  }
 0x42d   : > { %v2550_v6 = vpop.eup %2549 }
 0x42e   : > { %2109 = vperm.xlu1 %2536, %v2550_v6   ;;  %v2552_v18 = vpop.eup %2551 }
 0x42f   : > { %2140 = vperm.xlu0 %2535, %v2134_v20   ;;  %v2560_v20 = vld [vmem:[%s2860_s17 + $0x38] sm:$0xff] }
 0x432   : > { %2104 = vperm.xlu1 %2536, %v2552_v18  }
 0x433   : > { %2150 = vperm.xlu0 %2535, %v2136_v7  }
 0x436   : > { %2145 = vperm.xlu1 %2536, %v2135_v50  }
 0x43a   : > { %2155 = vperm.xlu1 %2536, %v2137_v8  }
 0x4a5   : > { %v2120_v27 = vpop.permute.xlu1 %2119 }
 0x4a6   : > { %v2128_v22 = vmul.f32 %v2120_v27, %v2002_v44  ;;  %v2129_v57 = vmul.f32 %v2120_v27, %v2003_v63  ;;  %v2115_v24 = vpop.permute.xlu0 %2114 }
 0x4a7   : > { %v2127_v56 = vmul.f32 %v2115_v24, %v2001_v34  ;;  %v2126_v58 = vmul.f32 %v2115_v24, %v2000_v32  ;;  %v2553_v34 = vld [vmem:[%s2860_s17] sm:$0xff]  ;;  %s2697_s17 = smov [#allocation7]  }
 0x4a8   : > { %2194 = vmatprep.subr.mxu0 %v2129_v57  ;;  %s2617_s19 = sshll.u32 %s2697_s17, 4  ;;  %s2618_s19 = int_to_ptr.vmem [resolvable:$false] %s2617_s19 }
 0x4a9   : > { %2195 = vmatpush1.msra.mxu0 %v2128_v22  ;;  %v2110_v29 = vpop.permute.xlu1 %2109  ;;  %s2619_s27 = scalar_lea.vmem %s2618_s19, 2048  ;;  %p2620_p1 = scmp.lt.s32.totalorder %s3684_s15, %s2618_s19 }
 0x4aa   : > { %v2124_v61 = vmul.f32 %v2110_v29, %v1998_v35  ;;  %v2125_v36 = vmul.f32 %v2110_v29, %v1999_v0  ;;  %2196 = vmatprep.subr.mxu0 %v2127_v56  ;;  %p2621_p3 = scmp.lt.s32.totalorder %s2619_s27, %s2613_s25 }
 0x4ab   : > { %2197 = vmatpush1.msra.mxu0 %v2126_v58 }
 0x4ac   : > { %2198 = vmatprep.subr.mxu0 %v2125_v36  ;;  %p2622_p2 = por %p2621_p3, %p2620_p1 }
 0x4ad   : > { %v2105_v51 = vpop.permute.xlu1 %2104  ;;  %2199 = vmatpush1.msra.mxu0 %v2124_v61 }
 0x4ae   : > { %v2122_v23 = vmul.f32 %v2105_v51, %v1996_v14  ;;  %v2123_v33 = vmul.f32 %v2105_v51, %v1997_v43  ;;  %v2133_v14 = vld [vmem:[%s3746_s10 + $0x18] sm:$0xff]  ;;  %v2141_v43 = vpop.permute.xlu0 %2140  ;;  %p2623_p4 = pnand %p2622_p2, %p2616_p0 }
 0x4b0   : > { %2200 = vmatprep.subr.mxu0 %v2123_v33 }
 0x4b1   : > { %2201 = vmatpush1.msra.mxu0 %v2122_v23  ;;  %v2146_v40 = vpop.permute.xlu1 %2145 }
 0x4b2   : > { %2443 = vmatmul.mubr.msk.f32.vlgmr.msra.gmra.mxu0 %vm476_vm0, %v2130_v15  ;;  %v2151_v49 = vpop.permute.xlu0 %2150 }
 0x4b3   : > { %2240 = vmatprep.mubr.f32.mxu0 %v3771_v28 }
 0x4b5   : > { %v2156_v17 = vpop.permute.xlu1 %2155 }
 0x4b6   : > { %2444 = vmatmul.mubr.msk.f32.gmra.mxu0 %vm476_vm0, %v2131_v25 }
 0x4b7   : > { %2246 = vmatprep.mubr.f32.mxu0 %v3771_v28 }
 0x4ba   : > { %2445 = vmatmul.mubr.msk.f32.gmra.mxu0 %vm476_vm0, %v2132_v19 }
 0x4bb   : > { %2252 = vmatprep.mubr.f32.mxu0 %v3771_v28 }
 0x4be   : > { %2446 = vmatmul.mubr.msk.f32.gmra.mxu0 %vm476_vm0, %v2133_v14 }
 0x572   : > { %v2236_v35 = vpop.f32.mrf.mxu0 }
 0x573   : > { %v2237_v0 = vadd.f32 %v2236_v35, %v2141_v43 }
 0x574   : > { %v2238_v32 = vpop.f32.mrf.mxu0 }
 0x575   : > { %v2259_v44 = vadd.f32 %v2553_v34, %v2237_v0  ;;  %v2239_v63 = vadd.f32 %v2238_v32, %v2141_v43 }
 0x576   : > { %v2242_v5 = vpop.f32.mrf.mxu0 }
 0x577   : > { %v2267_v30 = vmax.f32 %v2259_v44, 0.0  ;;  %v2260_v31 = vadd.f32 %v2554_v11, %v2239_v63  ;;  %v2243_v9 = vadd.f32 %v2242_v5, %v2146_v40 }
 0x578   : > { %v2244_v55 = vpop.f32.mrf.mxu0 }
 0x579   : > { %2275 = vst [vmem:[%s3668_s30] sm:$0xff] %v2267_v30  ;;  %v2268_v54 = vmax.f32 %v2260_v31, 0.0  ;;  %v2261_v10 = vadd.f32 %v2555_v12, %v2243_v9  ;;  %v2245_v38 = vadd.f32 %v2244_v55, %v2146_v40 }
 0x57a   : > { %v2248_v1 = vpop.f32.mrf.mxu0 }
 0x57b   : > { %2276 = vst [vmem:[%s3668_s30 + $0x8] sm:$0xff] %v2268_v54  ;;  %v2269_v45 = vmax.f32 %v2261_v10, 0.0  ;;  %v2262_v47 = vadd.f32 %v2556_v46, %v2245_v38  ;;  %v2249_v26 = vadd.f32 %v2248_v1, %v2151_v49 }
 0x57c   : > { %v2250_v37 = vpop.f32.mrf.mxu0 }
 0x57d   : > { %2277 = vst [vmem:[%s3668_s30 + $0x10] sm:$0xff] %v2269_v45  ;;  %v2270_v41 = vmax.f32 %v2262_v47, 0.0  ;;  %v2263_v62 = vadd.f32 %v2557_v13, %v2249_v26  ;;  %v2251_v59 = vadd.f32 %v2250_v37, %v2151_v49 }
 0x57e   : > { %v2254_v60 = vpop.f32.mrf.mxu0 }
 0x57f   : > { %2278 = vst [vmem:[%s3668_s30 + $0x18] sm:$0xff] %v2270_v41  ;;  %v2271_v48 = vmax.f32 %v2263_v62, 0.0  ;;  %v2264_v2 = vadd.f32 %v2558_v39, %v2251_v59  ;;  %v2255_v42 = vadd.f32 %v2254_v60, %v2156_v17 }
 0x580   : > { %v2256_v16 = vpop.f32.mrf.mxu0 }
 0x581   : > { %2279 = vst [vmem:[%s3668_s30 + $0x20] sm:$0xff] %v2271_v48  ;;  %v2272_v21 = vmax.f32 %v2264_v2, 0.0  ;;  %v2265_v52 = vadd.f32 %v2559_v3, %v2255_v42  ;;  %v2257_v53 = vadd.f32 %v2256_v16, %v2156_v17 }
 0x583   : > { %2280 = vst [vmem:[%s3668_s30 + $0x28] sm:$0xff] %v2272_v21  ;;  %v2273_v4 = vmax.f32 %v2265_v52, 0.0  ;;  %v2266_v6 = vadd.f32 %v2560_v20, %v2257_v53 }
 0x585   : > { %2281 = vst [vmem:[%s3668_s30 + $0x30] sm:$0xff] %v2273_v4  ;;  %v2274_v7 = vmax.f32 %v2266_v6, 0.0 }
 0x587   : > { %2282 = vst [vmem:[%s3668_s30 + $0x38] sm:$0xff] %v2274_v7 }
 0x588   : > { %2626 = shalt.err (!%p2623_p4)
}
 0x589   : > { %s2627_s23 = scalar_lea.hbm %s3690_s29, 1024  ;;  %s2631_s20 = scalar_lea.hbm %s3748_s12, 2048 }
 0x58a   : > { %p2628_p7 = scmp.ne.s32.totalorder %s3690_s29, %s2627_s23  ;;  %p2632_p9 = scmp.lt.s32.totalorder %s3690_s29, %s3748_s12 }
 0x58b   : > { %p2633_p11 = scmp.lt.s32.totalorder %s2631_s20, %s2627_s23 }
 0x58c   : > { %p2629_p13 = pnand %p2628_p7, %p2802_p5 }
 0x58d   : > { %p2634_p10 = por %p2633_p11, %p2632_p9 }
 0x58e   : > { %p2630_p8 = pneg %p2629_p13 }
 0x590   : > { %p2635_p12 = pnand %p2634_p10, %p2630_p8 }
 0x592   : > { %2638 = shalt.err (!%p2635_p12)
}
 0x593   : > { %s2698_s25 = smov 256  }
 0x594   : > { %2470 = dma.vmem_to_hbm [thread:$0]  (%p2802_p5), %s3684_s15, 1024, %s3690_s29, %s3695_s16, %s2698_s25, %s2698_s25, %s2690_s26  }
 0x595 PF: > { %p2487_p0 = scmp.ge.s32.totalorder %s2681_s24, 2  ;;  %s2312_s19 = sand.u32 1, %s2669_s21  }
 0x596   : > { %s2313_s27 = scalar_lea.sflag [#allocation4], %s2312_s19 }
 0x597   : > { %p2480_p1 = pnand %p2487_p0, %p2806_p6 }
 0x599   : > { %p2481_p3 = pneg %p2480_p1 }
 0x59b   : > { %2664 = dma.done.wait (%p2481_p3), %s2313_s27, 1024  }
 0x59c   : > { %2666 = vsyncadd (%p2481_p3), %s2313_s27, 4294966272  ;;  %s3772_s24 = sld [smem:[#allocation12_spill]]  ;;  %s3775_s21 = smov %s2673_s22 }
 0x59d   : > { %s3773_s13 = sld [smem:[#allocation11_spill]] }
 0x59e   : > { %s3774_s23 = sld [smem:[#allocation13_spill]] }
 0x5a2   : > { %p24_p2 = scmp.ge.s32.totalorder %s3772_s24, 4  }
 0x5a3   : > { %s3776_s22 = smov %s3773_s13 }
 0x5a4   :  { %26 = sbr.rel (!%p24_p2) target bundleno = 5 (0x5), region = 127 }
 0x5a9   :  { %2318 = vsyncpa [#allocation3], 1 }
 0x5aa   :  { %2320 = vsyncpa [#allocation3 + $0x1], 1 }
 0x5ab   :  { %2321 = vsyncpa [#allocation6], 1 }
 0x5ac   :  { %2322 = vsyncpa [#allocation4], 1 }
 0x5ad   :  { %2324 = vsyncpa [#allocation4 + $0x1], 1 }

</bundles_post_ra>
